<compile_context>
chip_gen: v7x
topology: tpu7x:2x2x1
jax: 0.10.0
libtpu: 0.0.40
codegen_flags: <defaults>
</compile_context>

<pallas_src>
import functools
import math

import jax
import jax.numpy as jnp
from jax.experimental import pallas as pl
from jax.experimental.pallas import tpu as pltpu

_LANE = 128          # vreg lane width      -> pad feature/class dims to this
_SUBLANE_BF16 = 16   # bf16 packs 2 rows/sublane -> pad node dim to 16


def _round_up(v, m):
    return (v + m - 1) // m * m


def _pad_to(a, shape):
    return jnp.pad(a, [(0, t - s) for s, t in zip(a.shape, shape)])


# ------------------------------ Pallas kernel -------------------------------

def _resgcn10_kernel(x_ref, adj_ref, w01_ref, b0_ref, b1_ref,
                     wmid10_ref, bmid_ref, w10last_ref, b10_ref, out_ref,
                     *, nclass, hpad):
    """Fused ResGCN10 forward; all operands fully resident in VMEM."""
    f32, bf16 = jnp.float32, jnp.bfloat16
    H = hpad

    x = x_ref[...]        # [Np, Fp]  bf16
    adj = adj_ref[...]    # [Np, Np]  bf16

    # Module skip z and gc1 support from ONE 2H-wide MXU pass over x.
    zs = jnp.dot(x, w01_ref[...], preferred_element_type=f32)    # [Np, 2H] f32
    z = zs[:, :H] + b0_ref[...]                                  # f32 epilogue
    s = zs[:, H:].astype(bf16)                                   # feeds adj@s

    agg = jnp.dot(adj, s, preferred_element_type=f32)
    xk = jnp.maximum(agg + b1_ref[...], 0.0) + z                 # x1 (f32)

    # gc10 support accumulated on the fly (no [N, 9*nhid] concat is ever
    # materialized):  concat(x9..x1) @ W10 == sum_k x_k @ W10_block_k
    supp = None
    for k in range(8):                        # static unroll (small tiles)
        xkb = xk.astype(bf16)                 # ONE cast of x_{k+1} per layer
        # Wmid_k and x_{k+1}'s W10 block share the same LHS -> single fused
        # (H, H+C)-wide RHS pass; slice (128-lane aligned) into s / supp part.
        zs = jnp.dot(xkb, wmid10_ref[k], preferred_element_type=f32)
        s = zs[:, :H].astype(bf16)
        blk = zs[:, H:]                       # x_{k+1} @ W10_block_k, f32
        supp = blk if supp is None else supp + blk
        agg = jnp.dot(adj, s, preferred_element_type=f32)
        xk = jnp.maximum(agg + bmid_ref[k], 0.0) + xk             # x_{k+2}

    # x9's gc10 block has nothing left to fuse with.
    supp = supp + jnp.dot(xk.astype(bf16), w10last_ref[...],
                          preferred_element_type=f32)

    # gc10 (no relu): x10 = adj @ supp + b10
    x10 = jnp.dot(adj, supp.astype(bf16), preferred_element_type=f32) + b10_ref[...]

    # Row-wise log_softmax over the REAL class columns only; padded columns
    # are excluded from max/sum via jnp.where (no large-negative constant).
    col = jax.lax.broadcasted_iota(jnp.int32, x10.shape, 1)
    valid = col < nclass
    m = jnp.max(jnp.where(valid, x10, -jnp.inf), axis=-1, keepdims=True)
    sh = x10 - m
    lse = jnp.log(jnp.sum(jnp.where(valid, jnp.exp(sh), 0.0),
                          axis=-1, keepdims=True))
    out_ref[...] = sh - lse


# ------------------------------ Wrappers -------------------------------------

def _vmem_limit_bytes(arrays, out_bytes, npad, hpad, cpad):
    """Explicit VMEM budget: resident operands + live activations, clamped to
    a fraction of the chip's VMEM (v7x has 64 MiB per TensorCore)."""
    resident = sum(int(a.size) * a.dtype.itemsize for a in arrays) + out_bytes
    live = npad * (2 * hpad + cpad) * 4 * 6        # zs/z/xk/supp/agg/temps, f32
    need = resident + live + (4 << 20)             # Mosaic internal scratch
    try:
        cap = int(pltpu.get_tpu_info().vmem_capacity_bytes)
    except Exception:
        cap = 64 << 20
    return min(max(need, 32 << 20), int(cap * 0.8))


def resgcn10_forward(x, adj, params):
    """Fused ResGCN10 forward via a single pallas_call (lane-dense padding)."""
    (w0, b0), (w1, b1), mids, (w10, b10) = params
    n, nfeat = x.shape
    nhid = w0.shape[1]
    nclass = w10.shape[1]

    npad = _round_up(n, _SUBLANE_BF16)
    fpad = _round_up(nfeat, _LANE)
    hpad = _round_up(nhid, _LANE)
    cpad = _round_up(nclass, _LANE)

    bf16, f32 = jnp.bfloat16, jnp.float32

    x_p = _pad_to(x, (npad, fpad)).astype(bf16)
    # Padded adj rows/cols are exactly zero (jnp.pad) — required invariant so
    # the non-zero padded rows of z/x_k never leak into real rows via adj@(.).
    adj_p = _pad_to(adj, (npad, npad)).astype(bf16)

    # Fuse the module skip weight W0 with gc1's W1 (same LHS x) into a single
    # 2*hpad-wide RHS.
    w01_p = jnp.concatenate(
        [_pad_to(w0, (fpad, hpad)), _pad_to(w1, (fpad, hpad))], axis=1
    ).astype(bf16)
    b0_p = _pad_to(b0.reshape(1, -1), (1, hpad)).astype(f32)
    b1_p = _pad_to(b1.reshape(1, -1), (1, hpad)).astype(f32)

    # W10 row blocks.  PyTorch concat order is (x9, x8, ..., x1), so the block
    # that multiplies x_{k+1} is W10[(8-k)*nhid:(9-k)*nhid].
    w10_blocks = [w10[(8 - k) * nhid:(9 - k) * nhid] for k in range(9)]

    # Fuse gc_{k+2}'s weight with x_{k+1}'s W10 block (same LHS x_{k+1}) into a
    # (hpad, hpad+cpad) RHS per residual layer.
    wmid10_p = jnp.stack([
        jnp.concatenate([_pad_to(mids[k][0], (hpad, hpad)),
                         _pad_to(w10_blocks[k], (hpad, cpad))], axis=1)
        for k in range(8)]).astype(bf16)
    bmid_p = jnp.stack([_pad_to(mids[k][1].reshape(1, -1), (1, hpad))
                        for k in range(8)]).astype(f32)
    w10last_p = _pad_to(w10_blocks[8], (hpad, cpad)).astype(bf16)
    b10_p = _pad_to(b10.reshape(1, -1), (1, cpad)).astype(f32)

    inputs = (x_p, adj_p, w01_p, b0_p, b1_p, wmid10_p, bmid_p, w10last_p, b10_p)

    # memory_space-only specs: whole arrays placed in VMEM once, no blocked
    # pipeline / double buffering (adj is the dominant allocation).
    vmem_spec = pl.BlockSpec(memory_space=pltpu.MemorySpace.VMEM)
    limit = _vmem_limit_bytes(inputs, npad * cpad * 4, npad, hpad, cpad)

    out_p = pl.pallas_call(
        functools.partial(_resgcn10_kernel, nclass=nclass, hpad=hpad),
        out_shape=jax.ShapeDtypeStruct((npad, cpad), f32),
        in_specs=[vmem_spec] * len(inputs),
        out_specs=vmem_spec,
        compiler_params=pltpu.CompilerParams(vmem_limit_bytes=limit),
    )(*inputs)

    return out_p[:n, :nclass]


def resgcn10_reference(x, adj, params):
    """Pure-JAX reference (same bf16-input / f32-accumulate matmul policy)."""
    (w0, b0), (w1, b1), mids, (w10, b10) = params
    bf16, f32 = jnp.bfloat16, jnp.float32
    mm = lambda a, b: jnp.dot(a.astype(bf16), b.astype(bf16),
                              preferred_element_type=f32)
    z = mm(x, w0) + b0
    xk = jnp.maximum(mm(adj, mm(x, w1)) + b1, 0.0) + z
    xs = [xk]
    for w, b in mids:
        xk = jnp.maximum(mm(adj, mm(xk, w)) + b, 0.0) + xk
        xs.append(xk)
    x_cat = jnp.concatenate(xs[::-1], axis=1)        # (x9, x8, ..., x1)
    x10 = mm(adj, mm(x_cat, w10)) + b10
    return jax.nn.log_softmax(x10, axis=1)


def _init_linear(key, fan_in, fan_out):
    """Matches GraphConvolution.reset_parameters: U(-stdv, stdv), stdv=1/sqrt(out)."""
    stdv = 1.0 / math.sqrt(fan_out)
    kw, kb = jax.random.split(key)
    w = jax.random.uniform(kw, (fan_in, fan_out), jnp.float32, -stdv, stdv)
    b = jax.random.uniform(kb, (fan_out,), jnp.float32, -stdv, stdv)
    return w, b


def init_resgcn10_params(key, nfeat, nhid, nclass):
    keys = jax.random.split(key, 11)
    w0b0 = _init_linear(keys[0], nfeat, nhid)        # module weight / bias
    w1b1 = _init_linear(keys[1], nfeat, nhid)        # gc1
    mids = tuple(_init_linear(keys[2 + i], nhid, nhid) for i in range(8))  # gc2..gc9
    w10b10 = _init_linear(keys[10], 9 * nhid, nclass)  # gc10
    return w0b0, w1b1, mids, w10b10


# -------------------------------- Driver --------------------------------------

if __name__ == "__main__":
    # NOTE: toy shape for correctness only — at this size wall time is pure
    # launch/DMA overhead; benchmark at production N / nhid multiples of 128.
    N, nfeat, nhid, nclass = 16, 8, 32, 4

    key = jax.random.PRNGKey(0)
    kx, kadj, kp = jax.random.split(key, 3)

    x = jax.random.normal(kx, (N, nfeat), jnp.float32)

    # Symmetric, row-normalized dense adjacency with self loops.
    a = (jax.random.uniform(kadj, (N, N)) > 0.7).astype(jnp.float32)
    a = jnp.maximum(a, a.T) + jnp.eye(N, dtype=jnp.float32)
    deg = jnp.sum(a, axis=1, keepdims=True)
    adj = a / deg

    params = init_resgcn10_params(kp, nfeat, nhid, nclass)

    fwd = jax.jit(resgcn10_forward)
    out = fwd(x, adj, params)
    jax.block_until_ready(out)

    ref = resgcn10_reference(x, adj, params)

    assert out.shape == (N, nclass)
    assert bool(jnp.all(jnp.isfinite(out)))
    # Rows of log_softmax exponentiate-sum to 1.
    assert bool(jnp.allclose(jnp.sum(jnp.exp(out), axis=1), 1.0, atol=1e-4))
    # Matches the pure-JAX reference (same precision policy).
    assert bool(jnp.allclose(out, ref, atol=5e-3, rtol=5e-3))
    print("KERNEL_OK")
</pallas_src>

<mosaic_0001>
module attributes {stable_mosaic.version = 11 : i64} {
  func.func @_resgcn10_kernel(%arg0: memref<16x128xbf16, #tpu.memory_space<vmem>>, %arg1: memref<16x16xbf16, #tpu.memory_space<vmem>>, %arg2: memref<128x256xbf16, #tpu.memory_space<vmem>>, %arg3: memref<1x128xf32, #tpu.memory_space<vmem>>, %arg4: memref<1x128xf32, #tpu.memory_space<vmem>>, %arg5: memref<8x128x256xbf16, #tpu.memory_space<vmem>>, %arg6: memref<8x1x128xf32, #tpu.memory_space<vmem>>, %arg7: memref<128x128xbf16, #tpu.memory_space<vmem>>, %arg8: memref<1x128xf32, #tpu.memory_space<vmem>>, %arg9: memref<16x128xf32, #tpu.memory_space<vmem>>) attributes {dimension_semantics = [], scalar_prefetch = 0 : i64, scratch_operands = 0 : i64, tpu.core_type = #tpu.core_type<tc>} {
    %c0 = arith.constant 0 : index
    %c0_0 = arith.constant 0 : index
    %0 = vector.load %arg0[%c0, %c0_0] : memref<16x128xbf16, #tpu.memory_space<vmem>>, vector<16x128xbf16>
    %c0_1 = arith.constant 0 : index
    %c0_2 = arith.constant 0 : index
    %1 = vector.load %arg1[%c0_1, %c0_2] : memref<16x16xbf16, #tpu.memory_space<vmem>>, vector<16x16xbf16>
    %c0_3 = arith.constant 0 : index
    %c0_4 = arith.constant 0 : index
    %2 = vector.load %arg2[%c0_3, %c0_4] : memref<128x256xbf16, #tpu.memory_space<vmem>>, vector<128x256xbf16>
    %cst = arith.constant dense<0.000000e+00> : vector<16x256xf32>
    %3 = tpu.matmul %0, %2, %cst {dimension_numbers = #tpu.dot_dimension_numbers<[1], [0], [0], [1], [0, 0, 1, 1], [], []>} : vector<16x128xbf16>, vector<128x256xbf16>, vector<16x256xf32> -> vector<16x256xf32>
    %4 = vector.extract_strided_slice %3 {offsets = [0, 0], sizes = [16, 128], strides = [1, 1]} : vector<16x256xf32> to vector<16x128xf32>
    %c0_5 = arith.constant 0 : index
    %c0_6 = arith.constant 0 : index
    %5 = vector.load %arg3[%c0_5, %c0_6] : memref<1x128xf32, #tpu.memory_space<vmem>>, vector<1x128xf32>
    %6 = vector.broadcast %5 : vector<1x128xf32> to vector<16x128xf32>
    %7 = arith.addf %4, %6 : vector<16x128xf32>
    %8 = vector.extract_strided_slice %3 {offsets = [0, 128], sizes = [16, 128], strides = [1, 1]} : vector<16x256xf32> to vector<16x128xf32>
    %9 = arith.truncf %8 : vector<16x128xf32> to vector<16x128xbf16>
    %cst_7 = arith.constant dense<0.000000e+00> : vector<16x128xf32>
    %10 = tpu.matmul %1, %9, %cst_7 {dimension_numbers = #tpu.dot_dimension_numbers<[1], [0], [0], [1], [0, 0, 1, 1], [], []>} : vector<16x16xbf16>, vector<16x128xbf16>, vector<16x128xf32> -> vector<16x128xf32>
    %c0_8 = arith.constant 0 : index
    %c0_9 = arith.constant 0 : index
    %11 = vector.load %arg4[%c0_8, %c0_9] : memref<1x128xf32, #tpu.memory_space<vmem>>, vector<1x128xf32>
    %12 = vector.broadcast %11 : vector<1x128xf32> to vector<16x128xf32>
    %13 = arith.addf %10, %12 : vector<16x128xf32>
    %cst_10 = arith.constant 0.000000e+00 : f32
    %14 = vector.broadcast %cst_10 : f32 to vector<16x128xf32>
    %15 = arith.maximumf %13, %14 : vector<16x128xf32>
    %16 = arith.addf %15, %7 : vector<16x128xf32>
    %17 = arith.truncf %16 : vector<16x128xf32> to vector<16x128xbf16>
    %c0_11 = arith.constant 0 : index
    %c0_12 = arith.constant 0 : index
    %c0_13 = arith.constant 0 : index
    %18 = vector.load %arg5[%c0_11, %c0_12, %c0_13] : memref<8x128x256xbf16, #tpu.memory_space<vmem>>, vector<1x128x256xbf16>
    %19 = vector.shape_cast %18 : vector<1x128x256xbf16> to vector<128x256xbf16>
    %cst_14 = arith.constant dense<0.000000e+00> : vector<16x256xf32>
    %20 = tpu.matmul %17, %19, %cst_14 {dimension_numbers = #tpu.dot_dimension_numbers<[1], [0], [0], [1], [0, 0, 1, 1], [], []>} : vector<16x128xbf16>, vector<128x256xbf16>, vector<16x256xf32> -> vector<16x256xf32>
    %21 = vector.extract_strided_slice %20 {offsets = [0, 0], sizes = [16, 128], strides = [1, 1]} : vector<16x256xf32> to vector<16x128xf32>
    %22 = arith.truncf %21 : vector<16x128xf32> to vector<16x128xbf16>
    %23 = vector.extract_strided_slice %20 {offsets = [0, 128], sizes = [16, 128], strides = [1, 1]} : vector<16x256xf32> to vector<16x128xf32>
    %cst_15 = arith.constant dense<0.000000e+00> : vector<16x128xf32>
    %24 = tpu.matmul %1, %22, %cst_15 {dimension_numbers = #tpu.dot_dimension_numbers<[1], [0], [0], [1], [0, 0, 1, 1], [], []>} : vector<16x16xbf16>, vector<16x128xbf16>, vector<16x128xf32> -> vector<16x128xf32>
    %c0_16 = arith.constant 0 : index
    %c0_17 = arith.constant 0 : index
    %c0_18 = arith.constant 0 : index
    %25 = vector.load %arg6[%c0_16, %c0_17, %c0_18] : memref<8x1x128xf32, #tpu.memory_space<vmem>>, vector<1x1x128xf32>
    %26 = vector.shape_cast %25 : vector<1x1x128xf32> to vector<1x128xf32>
    %27 = vector.broadcast %26 : vector<1x128xf32> to vector<16x128xf32>
    %28 = arith.addf %24, %27 : vector<16x128xf32>
    %cst_19 = arith.constant 0.000000e+00 : f32
    %29 = vector.broadcast %cst_19 : f32 to vector<16x128xf32>
    %30 = arith.maximumf %28, %29 : vector<16x128xf32>
    %31 = arith.addf %30, %16 : vector<16x128xf32>
    %32 = arith.truncf %31 : vector<16x128xf32> to vector<16x128xbf16>
    %c1 = arith.constant 1 : index
    %c0_20 = arith.constant 0 : index
    %c0_21 = arith.constant 0 : index
    %33 = vector.load %arg5[%c1, %c0_20, %c0_21] : memref<8x128x256xbf16, #tpu.memory_space<vmem>>, vector<1x128x256xbf16>
    %34 = vector.shape_cast %33 : vector<1x128x256xbf16> to vector<128x256xbf16>
    %cst_22 = arith.constant dense<0.000000e+00> : vector<16x256xf32>
    %35 = tpu.matmul %32, %34, %cst_22 {dimension_numbers = #tpu.dot_dimension_numbers<[1], [0], [0], [1], [0, 0, 1, 1], [], []>} : vector<16x128xbf16>, vector<128x256xbf16>, vector<16x256xf32> -> vector<16x256xf32>
    %36 = vector.extract_strided_slice %35 {offsets = [0, 0], sizes = [16, 128], strides = [1, 1]} : vector<16x256xf32> to vector<16x128xf32>
    %37 = arith.truncf %36 : vector<16x128xf32> to vector<16x128xbf16>
    %38 = vector.extract_strided_slice %35 {offsets = [0, 128], sizes = [16, 128], strides = [1, 1]} : vector<16x256xf32> to vector<16x128xf32>
    %39 = arith.addf %23, %38 : vector<16x128xf32>
    %cst_23 = arith.constant dense<0.000000e+00> : vector<16x128xf32>
    %40 = tpu.matmul %1, %37, %cst_23 {dimension_numbers = #tpu.dot_dimension_numbers<[1], [0], [0], [1], [0, 0, 1, 1], [], []>} : vector<16x16xbf16>, vector<16x128xbf16>, vector<16x128xf32> -> vector<16x128xf32>
    %c1_24 = arith.constant 1 : index
    %c0_25 = arith.constant 0 : index
    %c0_26 = arith.constant 0 : index
    %41 = vector.load %arg6[%c1_24, %c0_25, %c0_26] : memref<8x1x128xf32, #tpu.memory_space<vmem>>, vector<1x1x128xf32>
    %42 = vector.shape_cast %41 : vector<1x1x128xf32> to vector<1x128xf32>
    %43 = vector.broadcast %42 : vector<1x128xf32> to vector<16x128xf32>
    %44 = arith.addf %40, %43 : vector<16x128xf32>
    %cst_27 = arith.constant 0.000000e+00 : f32
    %45 = vector.broadcast %cst_27 : f32 to vector<16x128xf32>
    %46 = arith.maximumf %44, %45 : vector<16x128xf32>
    %47 = arith.addf %46, %31 : vector<16x128xf32>
    %48 = arith.truncf %47 : vector<16x128xf32> to vector<16x128xbf16>
    %c2 = arith.constant 2 : index
    %c0_28 = arith.constant 0 : index
    %c0_29 = arith.constant 0 : index
    %49 = vector.load %arg5[%c2, %c0_28, %c0_29] : memref<8x128x256xbf16, #tpu.memory_space<vmem>>, vector<1x128x256xbf16>
    %50 = vector.shape_cast %49 : vector<1x128x256xbf16> to vector<128x256xbf16>
    %cst_30 = arith.constant dense<0.000000e+00> : vector<16x256xf32>
    %51 = tpu.matmul %48, %50, %cst_30 {dimension_numbers = #tpu.dot_dimension_numbers<[1], [0], [0], [1], [0, 0, 1, 1], [], []>} : vector<16x128xbf16>, vector<128x256xbf16>, vector<16x256xf32> -> vector<16x256xf32>
    %52 = vector.extract_strided_slice %51 {offsets = [0, 0], sizes = [16, 128], strides = [1, 1]} : vector<16x256xf32> to vector<16x128xf32>
    %53 = arith.truncf %52 : vector<16x128xf32> to vector<16x128xbf16>
    %54 = vector.extract_strided_slice %51 {offsets = [0, 128], sizes = [16, 128], strides = [1, 1]} : vector<16x256xf32> to vector<16x128xf32>
    %55 = arith.addf %39, %54 : vector<16x128xf32>
    %cst_31 = arith.constant dense<0.000000e+00> : vector<16x128xf32>
    %56 = tpu.matmul %1, %53, %cst_31 {dimension_numbers = #tpu.dot_dimension_numbers<[1], [0], [0], [1], [0, 0, 1, 1], [], []>} : vector<16x16xbf16>, vector<16x128xbf16>, vector<16x128xf32> -> vector<16x128xf32>
    %c2_32 = arith.constant 2 : index
    %c0_33 = arith.constant 0 : index
    %c0_34 = arith.constant 0 : index
    %57 = vector.load %arg6[%c2_32, %c0_33, %c0_34] : memref<8x1x128xf32, #tpu.memory_space<vmem>>, vector<1x1x128xf32>
    %58 = vector.shape_cast %57 : vector<1x1x128xf32> to vector<1x128xf32>
    %59 = vector.broadcast %58 : vector<1x128xf32> to vector<16x128xf32>
    %60 = arith.addf %56, %59 : vector<16x128xf32>
    %cst_35 = arith.constant 0.000000e+00 : f32
    %61 = vector.broadcast %cst_35 : f32 to vector<16x128xf32>
    %62 = arith.maximumf %60, %61 : vector<16x128xf32>
    %63 = arith.addf %62, %47 : vector<16x128xf32>
    %64 = arith.truncf %63 : vector<16x128xf32> to vector<16x128xbf16>
    %c3 = arith.constant 3 : index
    %c0_36 = arith.constant 0 : index
    %c0_37 = arith.constant 0 : index
    %65 = vector.load %arg5[%c3, %c0_36, %c0_37] : memref<8x128x256xbf16, #tpu.memory_space<vmem>>, vector<1x128x256xbf16>
    %66 = vector.shape_cast %65 : vector<1x128x256xbf16> to vector<128x256xbf16>
    %cst_38 = arith.constant dense<0.000000e+00> : vector<16x256xf32>
    %67 = tpu.matmul %64, %66, %cst_38 {dimension_numbers = #tpu.dot_dimension_numbers<[1], [0], [0], [1], [0, 0, 1, 1], [], []>} : vector<16x128xbf16>, vector<128x256xbf16>, vector<16x256xf32> -> vector<16x256xf32>
    %68 = vector.extract_strided_slice %67 {offsets = [0, 0], sizes = [16, 128], strides = [1, 1]} : vector<16x256xf32> to vector<16x128xf32>
    %69 = arith.truncf %68 : vector<16x128xf32> to vector<16x128xbf16>
    %70 = vector.extract_strided_slice %67 {offsets = [0, 128], sizes = [16, 128], strides = [1, 1]} : vector<16x256xf32> to vector<16x128xf32>
    %71 = arith.addf %55, %70 : vector<16x128xf32>
    %cst_39 = arith.constant dense<0.000000e+00> : vector<16x128xf32>
    %72 = tpu.matmul %1, %69, %cst_39 {dimension_numbers = #tpu.dot_dimension_numbers<[1], [0], [0], [1], [0, 0, 1, 1], [], []>} : vector<16x16xbf16>, vector<16x128xbf16>, vector<16x128xf32> -> vector<16x128xf32>
    %c3_40 = arith.constant 3 : index
    %c0_41 = arith.constant 0 : index
    %c0_42 = arith.constant 0 : index
    %73 = vector.load %arg6[%c3_40, %c0_41, %c0_42] : memref<8x1x128xf32, #tpu.memory_space<vmem>>, vector<1x1x128xf32>
    %74 = vector.shape_cast %73 : vector<1x1x128xf32> to vector<1x128xf32>
    %75 = vector.broadcast %74 : vector<1x128xf32> to vector<16x128xf32>
    %76 = arith.addf %72, %75 : vector<16x128xf32>
    %cst_43 = arith.constant 0.000000e+00 : f32
    %77 = vector.broadcast %cst_43 : f32 to vector<16x128xf32>
    %78 = arith.maximumf %76, %77 : vector<16x128xf32>
    %79 = arith.addf %78, %63 : vector<16x128xf32>
    %80 = arith.truncf %79 : vector<16x128xf32> to vector<16x128xbf16>
    %c4 = arith.constant 4 : index
    %c0_44 = arith.constant 0 : index
    %c0_45 = arith.constant 0 : index
    %81 = vector.load %arg5[%c4, %c0_44, %c0_45] : memref<8x128x256xbf16, #tpu.memory_space<vmem>>, vector<1x128x256xbf16>
    %82 = vector.shape_cast %81 : vector<1x128x256xbf16> to vector<128x256xbf16>
    %cst_46 = arith.constant dense<0.000000e+00> : vector<16x256xf32>
    %83 = tpu.matmul %80, %82, %cst_46 {dimension_numbers = #tpu.dot_dimension_numbers<[1], [0], [0], [1], [0, 0, 1, 1], [], []>} : vector<16x128xbf16>, vector<128x256xbf16>, vector<16x256xf32> -> vector<16x256xf32>
    %84 = vector.extract_strided_slice %83 {offsets = [0, 0], sizes = [16, 128], strides = [1, 1]} : vector<16x256xf32> to vector<16x128xf32>
    %85 = arith.truncf %84 : vector<16x128xf32> to vector<16x128xbf16>
    %86 = vector.extract_strided_slice %83 {offsets = [0, 128], sizes = [16, 128], strides = [1, 1]} : vector<16x256xf32> to vector<16x128xf32>
    %87 = arith.addf %71, %86 : vector<16x128xf32>
    %cst_47 = arith.constant dense<0.000000e+00> : vector<16x128xf32>
    %88 = tpu.matmul %1, %85, %cst_47 {dimension_numbers = #tpu.dot_dimension_numbers<[1], [0], [0], [1], [0, 0, 1, 1], [], []>} : vector<16x16xbf16>, vector<16x128xbf16>, vector<16x128xf32> -> vector<16x128xf32>
    %c4_48 = arith.constant 4 : index
    %c0_49 = arith.constant 0 : index
    %c0_50 = arith.constant 0 : index
    %89 = vector.load %arg6[%c4_48, %c0_49, %c0_50] : memref<8x1x128xf32, #tpu.memory_space<vmem>>, vector<1x1x128xf32>
    %90 = vector.shape_cast %89 : vector<1x1x128xf32> to vector<1x128xf32>
    %91 = vector.broadcast %90 : vector<1x128xf32> to vector<16x128xf32>
    %92 = arith.addf %88, %91 : vector<16x128xf32>
    %cst_51 = arith.constant 0.000000e+00 : f32
    %93 = vector.broadcast %cst_51 : f32 to vector<16x128xf32>
    %94 = arith.maximumf %92, %93 : vector<16x128xf32>
    %95 = arith.addf %94, %79 : vector<16x128xf32>
    %96 = arith.truncf %95 : vector<16x128xf32> to vector<16x128xbf16>
    %c5 = arith.constant 5 : index
    %c0_52 = arith.constant 0 : index
    %c0_53 = arith.constant 0 : index
    %97 = vector.load %arg5[%c5, %c0_52, %c0_53] : memref<8x128x256xbf16, #tpu.memory_space<vmem>>, vector<1x128x256xbf16>
    %98 = vector.shape_cast %97 : vector<1x128x256xbf16> to vector<128x256xbf16>
    %cst_54 = arith.constant dense<0.000000e+00> : vector<16x256xf32>
    %99 = tpu.matmul %96, %98, %cst_54 {dimension_numbers = #tpu.dot_dimension_numbers<[1], [0], [0], [1], [0, 0, 1, 1], [], []>} : vector<16x128xbf16>, vector<128x256xbf16>, vector<16x256xf32> -> vector<16x256xf32>
    %100 = vector.extract_strided_slice %99 {offsets = [0, 0], sizes = [16, 128], strides = [1, 1]} : vector<16x256xf32> to vector<16x128xf32>
    %101 = arith.truncf %100 : vector<16x128xf32> to vector<16x128xbf16>
    %102 = vector.extract_strided_slice %99 {offsets = [0, 128], sizes = [16, 128], strides = [1, 1]} : vector<16x256xf32> to vector<16x128xf32>
    %103 = arith.addf %87, %102 : vector<16x128xf32>
    %cst_55 = arith.constant dense<0.000000e+00> : vector<16x128xf32>
    %104 = tpu.matmul %1, %101, %cst_55 {dimension_numbers = #tpu.dot_dimension_numbers<[1], [0], [0], [1], [0, 0, 1, 1], [], []>} : vector<16x16xbf16>, vector<16x128xbf16>, vector<16x128xf32> -> vector<16x128xf32>
    %c5_56 = arith.constant 5 : index
    %c0_57 = arith.constant 0 : index
    %c0_58 = arith.constant 0 : index
    %105 = vector.load %arg6[%c5_56, %c0_57, %c0_58] : memref<8x1x128xf32, #tpu.memory_space<vmem>>, vector<1x1x128xf32>
    %106 = vector.shape_cast %105 : vector<1x1x128xf32> to vector<1x128xf32>
    %107 = vector.broadcast %106 : vector<1x128xf32> to vector<16x128xf32>
    %108 = arith.addf %104, %107 : vector<16x128xf32>
    %cst_59 = arith.constant 0.000000e+00 : f32
    %109 = vector.broadcast %cst_59 : f32 to vector<16x128xf32>
    %110 = arith.maximumf %108, %109 : vector<16x128xf32>
    %111 = arith.addf %110, %95 : vector<16x128xf32>
    %112 = arith.truncf %111 : vector<16x128xf32> to vector<16x128xbf16>
    %c6 = arith.constant 6 : index
    %c0_60 = arith.constant 0 : index
    %c0_61 = arith.constant 0 : index
    %113 = vector.load %arg5[%c6, %c0_60, %c0_61] : memref<8x128x256xbf16, #tpu.memory_space<vmem>>, vector<1x128x256xbf16>
    %114 = vector.shape_cast %113 : vector<1x128x256xbf16> to vector<128x256xbf16>
    %cst_62 = arith.constant dense<0.000000e+00> : vector<16x256xf32>
    %115 = tpu.matmul %112, %114, %cst_62 {dimension_numbers = #tpu.dot_dimension_numbers<[1], [0], [0], [1], [0, 0, 1, 1], [], []>} : vector<16x128xbf16>, vector<128x256xbf16>, vector<16x256xf32> -> vector<16x256xf32>
    %116 = vector.extract_strided_slice %115 {offsets = [0, 0], sizes = [16, 128], strides = [1, 1]} : vector<16x256xf32> to vector<16x128xf32>
    %117 = arith.truncf %116 : vector<16x128xf32> to vector<16x128xbf16>
    %118 = vector.extract_strided_slice %115 {offsets = [0, 128], sizes = [16, 128], strides = [1, 1]} : vector<16x256xf32> to vector<16x128xf32>
    %119 = arith.addf %103, %118 : vector<16x128xf32>
    %cst_63 = arith.constant dense<0.000000e+00> : vector<16x128xf32>
    %120 = tpu.matmul %1, %117, %cst_63 {dimension_numbers = #tpu.dot_dimension_numbers<[1], [0], [0], [1], [0, 0, 1, 1], [], []>} : vector<16x16xbf16>, vector<16x128xbf16>, vector<16x128xf32> -> vector<16x128xf32>
    %c6_64 = arith.constant 6 : index
    %c0_65 = arith.constant 0 : index
    %c0_66 = arith.constant 0 : index
    %121 = vector.load %arg6[%c6_64, %c0_65, %c0_66] : memref<8x1x128xf32, #tpu.memory_space<vmem>>, vector<1x1x128xf32>
    %122 = vector.shape_cast %121 : vector<1x1x128xf32> to vector<1x128xf32>
    %123 = vector.broadcast %122 : vector<1x128xf32> to vector<16x128xf32>
    %124 = arith.addf %120, %123 : vector<16x128xf32>
    %cst_67 = arith.constant 0.000000e+00 : f32
    %125 = vector.broadcast %cst_67 : f32 to vector<16x128xf32>
    %126 = arith.maximumf %124, %125 : vector<16x128xf32>
    %127 = arith.addf %126, %111 : vector<16x128xf32>
    %128 = arith.truncf %127 : vector<16x128xf32> to vector<16x128xbf16>
    %c7 = arith.constant 7 : index
    %c0_68 = arith.constant 0 : index
    %c0_69 = arith.constant 0 : index
    %129 = vector.load %arg5[%c7, %c0_68, %c0_69] : memref<8x128x256xbf16, #tpu.memory_space<vmem>>, vector<1x128x256xbf16>
    %130 = vector.shape_cast %129 : vector<1x128x256xbf16> to vector<128x256xbf16>
    %cst_70 = arith.constant dense<0.000000e+00> : vector<16x256xf32>
    %131 = tpu.matmul %128, %130, %cst_70 {dimension_numbers = #tpu.dot_dimension_numbers<[1], [0], [0], [1], [0, 0, 1, 1], [], []>} : vector<16x128xbf16>, vector<128x256xbf16>, vector<16x256xf32> -> vector<16x256xf32>
    %132 = vector.extract_strided_slice %131 {offsets = [0, 0], sizes = [16, 128], strides = [1, 1]} : vector<16x256xf32> to vector<16x128xf32>
    %133 = arith.truncf %132 : vector<16x128xf32> to vector<16x128xbf16>
    %134 = vector.extract_strided_slice %131 {offsets = [0, 128], sizes = [16, 128], strides = [1, 1]} : vector<16x256xf32> to vector<16x128xf32>
    %135 = arith.addf %119, %134 : vector<16x128xf32>
    %cst_71 = arith.constant dense<0.000000e+00> : vector<16x128xf32>
    %136 = tpu.matmul %1, %133, %cst_71 {dimension_numbers = #tpu.dot_dimension_numbers<[1], [0], [0], [1], [0, 0, 1, 1], [], []>} : vector<16x16xbf16>, vector<16x128xbf16>, vector<16x128xf32> -> vector<16x128xf32>
    %c7_72 = arith.constant 7 : index
    %c0_73 = arith.constant 0 : index
    %c0_74 = arith.constant 0 : index
    %137 = vector.load %arg6[%c7_72, %c0_73, %c0_74] : memref<8x1x128xf32, #tpu.memory_space<vmem>>, vector<1x1x128xf32>
    %138 = vector.shape_cast %137 : vector<1x1x128xf32> to vector<1x128xf32>
    %139 = vector.broadcast %138 : vector<1x128xf32> to vector<16x128xf32>
    %140 = arith.addf %136, %139 : vector<16x128xf32>
    %cst_75 = arith.constant 0.000000e+00 : f32
    %141 = vector.broadcast %cst_75 : f32 to vector<16x128xf32>
    %142 = arith.maximumf %140, %141 : vector<16x128xf32>
    %143 = arith.addf %142, %127 : vector<16x128xf32>
    %144 = arith.truncf %143 : vector<16x128xf32> to vector<16x128xbf16>
    %c0_76 = arith.constant 0 : index
    %c0_77 = arith.constant 0 : index
    %145 = vector.load %arg7[%c0_76, %c0_77] : memref<128x128xbf16, #tpu.memory_space<vmem>>, vector<128x128xbf16>
    %cst_78 = arith.constant dense<0.000000e+00> : vector<16x128xf32>
    %146 = tpu.matmul %144, %145, %cst_78 {dimension_numbers = #tpu.dot_dimension_numbers<[1], [0], [0], [1], [0, 0, 1, 1], [], []>} : vector<16x128xbf16>, vector<128x128xbf16>, vector<16x128xf32> -> vector<16x128xf32>
    %147 = arith.addf %135, %146 : vector<16x128xf32>
    %148 = arith.truncf %147 : vector<16x128xf32> to vector<16x128xbf16>
    %cst_79 = arith.constant dense<0.000000e+00> : vector<16x128xf32>
    %149 = tpu.matmul %1, %148, %cst_79 {dimension_numbers = #tpu.dot_dimension_numbers<[1], [0], [0], [1], [0, 0, 1, 1], [], []>} : vector<16x16xbf16>, vector<16x128xbf16>, vector<16x128xf32> -> vector<16x128xf32>
    %c0_80 = arith.constant 0 : index
    %c0_81 = arith.constant 0 : index
    %150 = vector.load %arg8[%c0_80, %c0_81] : memref<1x128xf32, #tpu.memory_space<vmem>>, vector<1x128xf32>
    %151 = vector.broadcast %150 : vector<1x128xf32> to vector<16x128xf32>
    %152 = arith.addf %149, %151 : vector<16x128xf32>
    %153 = tpu.iota {dimensions = array<i32: 1>} : vector<16x128xi32>
    %c4_i32 = arith.constant 4 : i32
    %154 = vector.broadcast %c4_i32 : i32 to vector<16x128xi32>
    %155 = arith.cmpi slt, %153, %154 : vector<16x128xi32>
    %cst_82 = arith.constant 0xFF800000 : f32
    %156 = vector.broadcast %cst_82 : f32 to vector<16x128xf32>
    %157 = arith.select %155, %152, %156 : vector<16x128xi1>, vector<16x128xf32>
    %cst_83 = arith.constant dense<0xFF800000> : vector<16xf32>
    %158 = vector.multi_reduction <maximumf>, %157, %cst_83 [1] : vector<16x128xf32> to vector<16xf32>
    %159 = vector.shape_cast %158 : vector<16xf32> to vector<16x1xf32>
    %160 = vector.broadcast %159 : vector<16x1xf32> to vector<16x128xf32>
    %161 = arith.subf %152, %160 : vector<16x128xf32>
    %162 = math.exp %161 : vector<16x128xf32>
    %cst_84 = arith.constant 0.000000e+00 : f32
    %163 = vector.broadcast %cst_84 : f32 to vector<16x128xf32>
    %164 = arith.select %155, %162, %163 : vector<16x128xi1>, vector<16x128xf32>
    %cst_85 = arith.constant dense<0.000000e+00> : vector<16xf32>
    %165 = vector.multi_reduction <add>, %164, %cst_85 [1] : vector<16x128xf32> to vector<16xf32>
    %166 = vector.shape_cast %165 : vector<16xf32> to vector<16x1xf32>
    %167 = math.log %166 : vector<16x1xf32>
    %168 = vector.broadcast %167 : vector<16x1xf32> to vector<16x128xf32>
    %169 = arith.subf %161, %168 : vector<16x128xf32>
    %c0_86 = arith.constant 0 : index
    %c0_87 = arith.constant 0 : index
    %170 = vector.load %arg9[%c0_86, %c0_87] : memref<16x128xf32, #tpu.memory_space<vmem>>, vector<16x128xf32>
    tpu.vector_store %arg9[%c0_86, %c0_87], %169 {strides = array<i32>} : memref<16x128xf32, #tpu.memory_space<vmem>>, vector<16x128xf32>,
    return
  }
}

</mosaic_0001>

<bundles_post_ra>
// kernel: resgcn10_forward.1
= control target key start
LH: loop header
LB: loop body
LE: loop exit
PB: predicated region body
PF: predicated region fallthrough
CT: control target
= control target key end

     0   :  { %v2656_v1 = vmov 0   ;;  %v2657_v18 = vmov 0.0   ;;  %vm2658_vm0 = vmmov 0   ;;  %vm204_vm1 = vcmask 130048   ;;  %s3287_s2 = inlined_call_operand.vmem [shape: bf16[128,256], index: 2, kind: input, shape index: {}]   ;;  %s3288_s0 = inlined_call_operand.vmem [shape: bf16[16,128], index: 0, kind: input, shape index: {}]   ;;  %s3289_s1 = inlined_call_operand.vmem [shape: bf16[16,16], index: 1, kind: input, shape index: {}]   ;;  %s3290_s5 = inlined_call_operand.vmem [shape: bf16[8,128,256], index: 5, kind: input, shape index: {}]   ;;  %s3291_s4 = inlined_call_operand.vmem [shape: f32[1,128], index: 4, kind: input, shape index: {}]   ;;  %s3292_s3 = inlined_call_operand.vmem [shape: f32[1,128], index: 3, kind: input, shape index: {}]   ;;  %s3293_s6 = inlined_call_operand.vmem [shape: f32[8,1,128], index: 6, kind: input, shape index: {}]   ;;  %s3294_s7 = inlined_call_operand.vmem [shape: bf16[128,128], index: 7, kind: input, shape index: {}]   ;;  %s3295_s8 = inlined_call_operand.vmem [shape: f32[1,128], index: 8, kind: input, shape index: {}]   ;;  %s3296_s9 = inlined_call_operand.vmem [shape: f32[16,128], index: 9, kind: output, shape index: {}]  }
   0x1   :  { %v2421_v0 = vld [vmem:[%s3287_s2 + $0x4] ss:$8 sps:$4 sm:$0xff]   ;;  %171 = vmatprep.mubr.bf16.mxu0 %v2656_v1  ;;  %v2423_v2 = vld [vmem:[%s3287_s2] ss:$8 sps:$4 sm:$0xff]   ;;  %v2424_v3 = vld [vmem:[%s3287_s2 + $0x14] ss:$8 sps:$4 sm:$0xff]   ;;  %2338 = vmatprep.subr.bf16.mxu1 %v2657_v18 }
   0x2   :  { %139 = vmatprep.subr.bf16.mxu0 %v2421_v0  ;;  %v2426_v4 = vld [vmem:[%s3287_s2 + $0x10] ss:$8 sps:$4 sm:$0xff]   ;;  %v2427_v5 = vld [vmem:[%s3287_s2 + $0x24] ss:$8 sps:$4 sm:$0xff]   ;;  %v2429_v6 = vld [vmem:[%s3287_s2 + $0x20] ss:$8 sps:$4 sm:$0xff]   ;;  %2340 = vmatprep.mubr.msk.bf16.mxu1 %vm2658_vm0, %v2657_v18 }
   0x3   :  { %140 = vmatpush1.bf16.msra.mxu0 %v2423_v2  ;;  %v2430_v7 = vld [vmem:[%s3287_s2 + $0x34] ss:$8 sps:$4 sm:$0xff]   ;;  %v2432_v8 = vld [vmem:[%s3287_s2 + $0x30] ss:$8 sps:$4 sm:$0xff]   ;;  %v2433_v9 = vld [vmem:[%s3287_s2 + $0x44] ss:$8 sps:$4 sm:$0xff]  }
   0x4   :  { %141 = vmatprep.subr.bf16.mxu0 %v2424_v3  ;;  %v2435_v10 = vld [vmem:[%s3287_s2 + $0x40] ss:$8 sps:$4 sm:$0xff]   ;;  %v2436_v11 = vld [vmem:[%s3287_s2 + $0x54] ss:$8 sps:$4 sm:$0xff]   ;;  %v2438_v12 = vld [vmem:[%s3287_s2 + $0x50] ss:$8 sps:$4 sm:$0xff]  }
   0x5   :  { %v2439_v13 = vld [vmem:[%s3287_s2 + $0x64] ss:$8 sps:$4 sm:$0xff]   ;;  %v2441_v14 = vld [vmem:[%s3287_s2 + $0x60] ss:$8 sps:$4 sm:$0xff]   ;;  %v2442_v15 = vld [vmem:[%s3287_s2 + $0x74] ss:$8 sps:$4 sm:$0xff]  }
   0x6   :  { %v2444_v16 = vld [vmem:[%s3287_s2 + $0x70] ss:$8 sps:$4 sm:$0xff]   ;;  %v2445_v17 = vld [vmem:[%s3288_s0] sm:$0xff]   ;;  %v2452_v27 = vld [vmem:[%s3290_s5 + $0x14] ss:$8 sps:$4 sm:$0xff]  }
   0x7   :  { %142 = vmatpush1.bf16.msra.mxu0 %v2426_v4  ;;  %v2449_v23 = vld [vmem:[%s3290_s5 + $0x4] ss:$8 sps:$4 sm:$0xff]   ;;  %v2447_v26 = vld [vmem:[%s3290_s5] ss:$8 sps:$4 sm:$0xff]   ;;  %v2450_v28 = vld [vmem:[%s3290_s5 + $0x10] ss:$8 sps:$4 sm:$0xff]  }
   0x8   :  { %143 = vmatprep.subr.bf16.mxu0 %v2427_v5  ;;  %v2773_v25 = vld [vmem:[%s3289_s1] sm:$0xff]   ;;  %v2458_v31 = vld [vmem:[%s3290_s5 + $0x34] ss:$8 sps:$4 sm:$0xff]   ;;  %v2456_v32 = vld [vmem:[%s3290_s5 + $0x30] ss:$8 sps:$4 sm:$0xff]  }
   0x9   :  { %v2455_v29 = vld [vmem:[%s3290_s5 + $0x24] ss:$8 sps:$4 sm:$0xff]   ;;  %v2453_v30 = vld [vmem:[%s3290_s5 + $0x20] ss:$8 sps:$4 sm:$0xff]   ;;  %v2464_v35 = vld [vmem:[%s3290_s5 + $0x54] ss:$8 sps:$4 sm:$0xff]  }
   0xa   :  { %v2461_v33 = vld [vmem:[%s3290_s5 + $0x44] ss:$8 sps:$4 sm:$0xff]   ;;  %v2459_v34 = vld [vmem:[%s3290_s5 + $0x40] ss:$8 sps:$4 sm:$0xff]   ;;  %v2462_v36 = vld [vmem:[%s3290_s5 + $0x50] ss:$8 sps:$4 sm:$0xff]  }
   0xb   :  { %144 = vmatpush1.bf16.msra.mxu0 %v2429_v6  ;;  %v2467_v37 = vld [vmem:[%s3290_s5 + $0x64] ss:$8 sps:$4 sm:$0xff]   ;;  %v2465_v38 = vld [vmem:[%s3290_s5 + $0x60] ss:$8 sps:$4 sm:$0xff]   ;;  %v2470_v39 = vld [vmem:[%s3290_s5 + $0x74] ss:$8 sps:$4 sm:$0xff]  }
   0xc   :  { %145 = vmatprep.subr.bf16.mxu0 %v2430_v7  ;;  %v2468_v40 = vld [vmem:[%s3290_s5 + $0x70] ss:$8 sps:$4 sm:$0xff]   ;;  %v2033_v41 = vld [vmem:[%s3291_s4] ss:$0 sm:$0xff]  ;;  %v2473_v57 = vld [vmem:[%s3290_s5 + $0x84] ss:$8 sps:$4 sm:$0xff]  }
   0xd   :  { %v2032_v42 = vld [vmem:[%s3292_s3] ss:$0 sm:$0xff]  ;;  %v2476_v58 = vld [vmem:[%s3290_s5 + $0x94] ss:$8 sps:$4 sm:$0xff]   ;;  %v2474_v59 = vld [vmem:[%s3290_s5 + $0x90] ss:$8 sps:$4 sm:$0xff]  }
   0xe   :  { %v2471_v56 = vld [vmem:[%s3290_s5 + $0x80] ss:$8 sps:$4 sm:$0xff]   ;;  %v2479_v60 = vld [vmem:[%s3290_s5 + $0xa4] ss:$8 sps:$4 sm:$0xff]   ;;  %v2482_v62 = vld [vmem:[%s3290_s5 + $0xb4] ss:$8 sps:$4 sm:$0xff]  }
   0xf   :  { %146 = vmatpush1.bf16.msra.mxu0 %v2432_v8  ;;  %v2477_v61 = vld [vmem:[%s3290_s5 + $0xa0] ss:$8 sps:$4 sm:$0xff]   ;;  %v2480_v63 = vld [vmem:[%s3290_s5 + $0xb0] ss:$8 sps:$4 sm:$0xff]   ;;  %v2485_v0 = vld [vmem:[%s3290_s5 + $0xc4] ss:$8 sps:$4 sm:$0xff]  }
  0x10   :  { %147 = vmatprep.subr.bf16.mxu0 %v2433_v9  ;;  %v2483_v2 = vld [vmem:[%s3290_s5 + $0xc0] ss:$8 sps:$4 sm:$0xff]   ;;  %v2488_v3 = vld [vmem:[%s3290_s5 + $0xd4] ss:$8 sps:$4 sm:$0xff]   ;;  %v2486_v4 = vld [vmem:[%s3290_s5 + $0xd0] ss:$8 sps:$4 sm:$0xff]  }
  0x13   :  { %148 = vmatpush1.bf16.msra.mxu0 %v2435_v10  ;;  %v2491_v10 = vld [vmem:[%s3290_s5 + $0xe4] ss:$8 sps:$4 sm:$0xff]  }
  0x14   :  { %149 = vmatprep.subr.bf16.mxu0 %v2436_v11  ;;  %v2489_v11 = vld [vmem:[%s3290_s5 + $0xe0] ss:$8 sps:$4 sm:$0xff]  }
  0x17   :  { %150 = vmatpush1.bf16.msra.mxu0 %v2438_v12  ;;  %v2494_v12 = vld [vmem:[%s3290_s5 + $0xf4] ss:$8 sps:$4 sm:$0xff]  }
  0x18   :  { %151 = vmatprep.subr.bf16.mxu0 %v2439_v13  ;;  %v2492_v13 = vld [vmem:[%s3290_s5 + $0xf0] ss:$8 sps:$4 sm:$0xff]  }
  0x1b   :  { %152 = vmatpush1.bf16.msra.mxu0 %v2441_v14  ;;  %v2052_v14 = vld [vmem:[%s3293_s6] ss:$0 sm:$0xff] }
  0x1c   :  { %153 = vmatprep.subr.bf16.mxu0 %v2442_v15 }
  0x1f   :  { %154 = vmatpush1.bf16.msra.mxu0 %v2444_v16 }
  0x20   :  { %2344 = vmatprep.subr.bf16.mxu0 %v2657_v18 }
  0x22   :  { %172 = vmatmul.mubr.bf16.vlgmr.msra.gmra.mrb[0].mxu0 %v2445_v17 }
  0x23   :  { %2346 = vmatprep.mubr.msk.bf16.mxu0 %vm2658_vm0, %v2657_v18 }
  0xf5   :  { %v173_v19 = vpop.f32.mrb[0].mxu0 }
  0xf6   :  { %v175_v20 = vpop.f32.mrb[1].mxu0  ;;  %v189_v47 = vadd.f32 %v2032_v42, %v173_v19 }
  0xf7   :  { %v177_v21 = vpop.f32.mrb[2].mxu0 }
  0xf8   :  { %v179_v22 = vpop.f32.mrb[3].mxu0  ;;  %v190_v51 = vadd.f32 %v2032_v42, %v177_v21  ;;  %v2504_v42 = vld [vmem:[%s3290_s5 + $0x130] ss:$8 sps:$4 sm:$0xff]  }
  0xf9   :  { %v191_v24 = vpack.c.bf16 %v179_v22, %v175_v20 }
  0xfb   :  { %2339 = vmatpush3.bf16.msra.mxu1 %v191_v24 }
  0xfc   :  { %350 = vmatprep.subr.bf16.mxu1 %v2449_v23 }
  0xfe   :  { %2341 = vmatmul.mubr.msk.bf16.vlgmr.msra.gmra.mrb[0].mxu1 %vm204_vm1, %v2773_v25 }
  0xff   :  { %351 = vmatpush1.bf16.msra.mxu1 %v2447_v26  ;;  %382 = vmatprep.mubr.bf16.mxu1 %v2656_v1 }
 0x100   :  { %352 = vmatprep.subr.bf16.mxu1 %v2452_v27 }
 0x103   :  { %353 = vmatpush1.bf16.msra.mxu1 %v2450_v28 }
 0x104   :  { %354 = vmatprep.subr.bf16.mxu1 %v2455_v29 }
 0x107   :  { %355 = vmatpush1.bf16.msra.mxu1 %v2453_v30 }
 0x108   :  { %356 = vmatprep.subr.bf16.mxu1 %v2458_v31 }
 0x10b   :  { %357 = vmatpush1.bf16.msra.mxu1 %v2456_v32  ;;  %v2497_v32 = vld [vmem:[%s3290_s5 + $0x104] ss:$8 sps:$4 sm:$0xff]  }
 0x10c   :  { %358 = vmatprep.subr.bf16.mxu1 %v2461_v33 }
 0x10f   :  { %359 = vmatpush1.bf16.msra.mxu1 %v2459_v34 }
 0x110   :  { %360 = vmatprep.subr.bf16.mxu1 %v2464_v35 }
 0x113   :  { %361 = vmatpush1.bf16.msra.mxu1 %v2462_v36  ;;  %v2495_v36 = vld [vmem:[%s3290_s5 + $0x100] ss:$8 sps:$4 sm:$0xff]  }
 0x114   :  { %362 = vmatprep.subr.bf16.mxu1 %v2467_v37  ;;  %v2500_v37 = vld [vmem:[%s3290_s5 + $0x114] ss:$8 sps:$4 sm:$0xff]  }
 0x117   :  { %363 = vmatpush1.bf16.msra.mxu1 %v2465_v38  ;;  %v2498_v38 = vld [vmem:[%s3290_s5 + $0x110] ss:$8 sps:$4 sm:$0xff]  }
 0x118   :  { %364 = vmatprep.subr.bf16.mxu1 %v2470_v39  ;;  %v2503_v39 = vld [vmem:[%s3290_s5 + $0x124] ss:$8 sps:$4 sm:$0xff]  }
 0x11b   :  { %365 = vmatpush1.bf16.msra.mxu1 %v2468_v40  ;;  %v2501_v40 = vld [vmem:[%s3290_s5 + $0x120] ss:$8 sps:$4 sm:$0xff]  }
 0x11c   :  { %544 = vmatprep.subr.bf16.mxu1 %v2473_v57 }
 0x1d1   :  { %v242_v43 = vpop.f32.mrb[0].mxu1 }
 0x1d2   :  { %v243_v44 = vadd.f32 %v2033_v41, %v242_v43  ;;  %v2342_v45 = vpop.f32.mrb[1].mxu1  ;;  %v2509_v43 = vld [vmem:[%s3290_s5 + $0x144] ss:$8 sps:$4 sm:$0xff]  }
 0x1d3   :  { %v245_v46 = vpop.f32.mrb[2].mxu1  ;;  %v2512_v45 = vld [vmem:[%s3290_s5 + $0x154] ss:$8 sps:$4 sm:$0xff]  }
 0x1d4   :  { %v249_v48 = vmax.f32 %v243_v44, 0.0  ;;  %v246_v49 = vadd.f32 %v2033_v41, %v245_v46  ;;  %v2343_v50 = vpop.f32.mrb[3].mxu1  ;;  %v2506_v41 = vld [vmem:[%s3290_s5 + $0x134] ss:$8 sps:$4 sm:$0xff]   ;;  %v2507_v44 = vld [vmem:[%s3290_s5 + $0x140] ss:$8 sps:$4 sm:$0xff]  }
 0x1d5   :  { %v2510_v46 = vld [vmem:[%s3290_s5 + $0x150] ss:$8 sps:$4 sm:$0xff]  }
 0x1d6   :  { %v251_v52 = vadd.f32 %v249_v48, %v189_v47  ;;  %v250_v53 = vmax.f32 %v246_v49, 0.0  ;;  %v2515_v47 = vld [vmem:[%s3290_s5 + $0x164] ss:$8 sps:$4 sm:$0xff]   ;;  %v2513_v48 = vld [vmem:[%s3290_s5 + $0x160] ss:$8 sps:$4 sm:$0xff]  }
 0x1d7   :  { %v2518_v49 = vld [vmem:[%s3290_s5 + $0x174] ss:$8 sps:$4 sm:$0xff]   ;;  %v2516_v50 = vld [vmem:[%s3290_s5 + $0x170] ss:$8 sps:$4 sm:$0xff]  }
 0x1d8   :  { %v252_v54 = vadd.f32 %v250_v53, %v190_v51  ;;  %v2087_v51 = vld [vmem:[%s3293_s6 + $0x1] ss:$0 sm:$0xff] }
 0x1da   :  { %v253_v55 = vpack.c.bf16 %v252_v54, %v251_v52 }
 0x1dc   :  { %383 = vmatmul.mubr.bf16.vlgmr.msra.gmra.mrb[4].mxu1 %v253_v55 }
 0x1dd   :  { %576 = vmatprep.mubr.bf16.mxu1 %v2656_v1  ;;  %545 = vmatpush1.bf16.msra.mxu1 %v2471_v56 }
 0x1de   :  { %546 = vmatprep.subr.bf16.mxu1 %v2476_v58 }
 0x1e1   :  { %547 = vmatpush1.bf16.msra.mxu1 %v2474_v59 }
 0x1e2   :  { %548 = vmatprep.subr.bf16.mxu1 %v2479_v60 }
 0x1e5   :  { %549 = vmatpush1.bf16.msra.mxu1 %v2477_v61 }
 0x1e6   :  { %550 = vmatprep.subr.bf16.mxu1 %v2482_v62 }
 0x1e9   :  { %551 = vmatpush1.bf16.msra.mxu1 %v2480_v63 }
 0x1ea   :  { %552 = vmatprep.subr.bf16.mxu1 %v2485_v0 }
 0x1ed   :  { %553 = vmatpush1.bf16.msra.mxu1 %v2483_v2 }
 0x1ee   :  { %554 = vmatprep.subr.bf16.mxu1 %v2488_v3 }
 0x1f1   :  { %555 = vmatpush1.bf16.msra.mxu1 %v2486_v4  ;;  %v2521_v4 = vld [vmem:[%s3290_s5 + $0x184] ss:$8 sps:$4 sm:$0xff]  }
 0x1f2   :  { %556 = vmatprep.subr.bf16.mxu1 %v2491_v10  ;;  %v2522_v10 = vld [vmem:[%s3290_s5 + $0x190] ss:$8 sps:$4 sm:$0xff]  }
 0x1f5   :  { %557 = vmatpush1.bf16.msra.mxu1 %v2489_v11  ;;  %v2527_v11 = vld [vmem:[%s3290_s5 + $0x1a4] ss:$8 sps:$4 sm:$0xff]  }
 0x1f6   :  { %558 = vmatprep.subr.bf16.mxu1 %v2494_v12  ;;  %v2525_v12 = vld [vmem:[%s3290_s5 + $0x1a0] ss:$8 sps:$4 sm:$0xff]  }
 0x1f9   :  { %559 = vmatpush1.bf16.msra.mxu1 %v2492_v13  ;;  %v2530_v13 = vld [vmem:[%s3290_s5 + $0x1b4] ss:$8 sps:$4 sm:$0xff]  }
 0x1fa   :  { %2356 = vmatprep.subr.bf16.mxu1 %v2657_v18 }
 0x2af   :  { %v384_v5 = vpop.f32.mrb[4].mxu1 }
 0x2b0   :  { %v386_v6 = vpop.f32.mrb[5].mxu1 }
 0x2b1   :  { %v388_v7 = vpop.f32.mrb[6].mxu1 }
 0x2b2   :  { %v393_v8 = vpack.c.bf16 %v388_v7, %v384_v5  ;;  %v390_v9 = vpop.f32.mrb[7].mxu1 }
 0x2b4   :  { %2345 = vmatpush3.bf16.msra.mxu0 %v393_v8  ;;  %v2519_v8 = vld [vmem:[%s3290_s5 + $0x180] ss:$8 sps:$4 sm:$0xff]  }
 0x2b5   :  { %2350 = vmatprep.subr.bf16.mxu0 %v2657_v18 }
 0x2b7   :  { %2347 = vmatmul.mubr.msk.bf16.vlgmr.msra.gmra.mrb[4].mxu0 %vm204_vm1, %v2773_v25 }
 0x2b8   :  { %2352 = vmatprep.mubr.msk.bf16.mxu0 %vm2658_vm0, %v2657_v18 }
 0x38a   :  { %v435_v15 = vpop.f32.mrb[4].mxu0 }
 0x38b   :  { %v436_v16 = vadd.f32 %v2052_v14, %v435_v15  ;;  %v2348_v17 = vpop.f32.mrb[5].mxu0  ;;  %v2533_v15 = vld [vmem:[%s3290_s5 + $0x1c4] ss:$8 sps:$4 sm:$0xff]  }
 0x38c   :  { %v438_v19 = vpop.f32.mrb[6].mxu0  ;;  %v2536_v17 = vld [vmem:[%s3290_s5 + $0x1d4] ss:$8 sps:$4 sm:$0xff]  }
 0x38d   :  { %v442_v20 = vmax.f32 %v436_v16, 0.0  ;;  %v439_v21 = vadd.f32 %v2052_v14, %v438_v19  ;;  %v2349_v22 = vpop.f32.mrb[7].mxu0  ;;  %v2528_v14 = vld [vmem:[%s3290_s5 + $0x1b0] ss:$8 sps:$4 sm:$0xff]   ;;  %v2531_v16 = vld [vmem:[%s3290_s5 + $0x1c0] ss:$8 sps:$4 sm:$0xff]  }
 0x38e   :  { %v2534_v19 = vld [vmem:[%s3290_s5 + $0x1d0] ss:$8 sps:$4 sm:$0xff]   ;;  %v2542_v22 = vld [vmem:[%s3290_s5 + $0x1f4] ss:$8 sps:$4 sm:$0xff]  }
 0x38f   :  { %v443_v23 = vmax.f32 %v439_v21, 0.0  ;;  %v444_v24 = vadd.f32 %v442_v20, %v251_v52  ;;  %v2539_v20 = vld [vmem:[%s3290_s5 + $0x1e4] ss:$8 sps:$4 sm:$0xff]   ;;  %v2537_v21 = vld [vmem:[%s3290_s5 + $0x1e0] ss:$8 sps:$4 sm:$0xff]  }
 0x391   :  { %v445_v26 = vadd.f32 %v443_v23, %v252_v54  ;;  %v2540_v23 = vld [vmem:[%s3290_s5 + $0x1f0] ss:$8 sps:$4 sm:$0xff]  }
 0x393   :  { %v446_v27 = vpack.c.bf16 %v445_v26, %v444_v24 }
 0x395   :  { %577 = vmatmul.mubr.bf16.vlgmr.msra.gmra.mrb[8].mxu1 %v446_v27 }
 0x396   :  { %2358 = vmatprep.mubr.msk.bf16.mxu1 %vm2658_vm0, %v2657_v18 }
 0x468   :  { %v578_v28 = vpop.f32.mrb[8].mxu1 }
 0x469   :  { %v580_v29 = vpop.f32.mrb[9].mxu1 }
 0x46a   :  { %v588_v30 = vadd.f32 %v580_v29, %v386_v6  ;;  %v582_v31 = vpop.f32.mrb[10].mxu1 }
 0x46b   :  { %v587_v33 = vpack.c.bf16 %v582_v31, %v578_v28  ;;  %v584_v34 = vpop.f32.mrb[11].mxu1 }
 0x46c   :  { %v589_v35 = vadd.f32 %v584_v34, %v390_v9  ;;  %v2524_v9 = vld [vmem:[%s3290_s5 + $0x194] ss:$8 sps:$4 sm:$0xff]  }
 0x46d   :  { %2351 = vmatpush3.bf16.msra.mxu0 %v587_v33 }
 0x46e   :  { %741 = vmatprep.subr.bf16.mxu0 %v2497_v32 }
 0x470   :  { %2353 = vmatmul.mubr.msk.bf16.vlgmr.msra.gmra.mrb[8].mxu0 %vm204_vm1, %v2773_v25 }
 0x471   :  { %742 = vmatpush1.bf16.msra.mxu0 %v2495_v36  ;;  %773 = vmatprep.mubr.bf16.mxu0 %v2656_v1 }
 0x472   :  { %743 = vmatprep.subr.bf16.mxu0 %v2500_v37 }
 0x475   :  { %744 = vmatpush1.bf16.msra.mxu0 %v2498_v38 }
 0x476   :  { %745 = vmatprep.subr.bf16.mxu0 %v2503_v39 }
 0x479   :  { %746 = vmatpush1.bf16.msra.mxu0 %v2501_v40 }
 0x47a   :  { %747 = vmatprep.subr.bf16.mxu0 %v2506_v41  ;;  %v2545_v41 = vld [vmem:[%s3290_s5 + $0x204] ss:$8 sps:$4 sm:$0xff]  }
 0x47d   :  { %748 = vmatpush1.bf16.msra.mxu0 %v2504_v42 }
 0x47e   :  { %749 = vmatprep.subr.bf16.mxu0 %v2509_v43 }
 0x481   :  { %750 = vmatpush1.bf16.msra.mxu0 %v2507_v44 }
 0x482   :  { %751 = vmatprep.subr.bf16.mxu0 %v2512_v45  ;;  %v2543_v45 = vld [vmem:[%s3290_s5 + $0x200] ss:$8 sps:$4 sm:$0xff]  }
 0x485   :  { %752 = vmatpush1.bf16.msra.mxu0 %v2510_v46  ;;  %v2548_v46 = vld [vmem:[%s3290_s5 + $0x214] ss:$8 sps:$4 sm:$0xff]  }
 0x486   :  { %753 = vmatprep.subr.bf16.mxu0 %v2515_v47  ;;  %v2546_v47 = vld [vmem:[%s3290_s5 + $0x210] ss:$8 sps:$4 sm:$0xff]  }
 0x489   :  { %754 = vmatpush1.bf16.msra.mxu0 %v2513_v48  ;;  %v2551_v48 = vld [vmem:[%s3290_s5 + $0x224] ss:$8 sps:$4 sm:$0xff]  }
 0x48a   :  { %755 = vmatprep.subr.bf16.mxu0 %v2518_v49  ;;  %v2549_v49 = vld [vmem:[%s3290_s5 + $0x220] ss:$8 sps:$4 sm:$0xff]  }
 0x48d   :  { %756 = vmatpush1.bf16.msra.mxu0 %v2516_v50  ;;  %v2554_v50 = vld [vmem:[%s3290_s5 + $0x234] ss:$8 sps:$4 sm:$0xff]  }
 0x48e   :  { %2362 = vmatprep.subr.bf16.mxu0 %v2657_v18 }
 0x543   :  { %v632_v52 = vpop.f32.mrb[8].mxu0 }
 0x544   :  { %v633_v53 = vadd.f32 %v2087_v51, %v632_v52  ;;  %v2354_v54 = vpop.f32.mrb[9].mxu0  ;;  %v2557_v52 = vld [vmem:[%s3290_s5 + $0x244] ss:$8 sps:$4 sm:$0xff]  }
 0x545   :  { %v635_v55 = vpop.f32.mrb[10].mxu0  ;;  %v2560_v54 = vld [vmem:[%s3290_s5 + $0x254] ss:$8 sps:$4 sm:$0xff]  }
 0x546   :  { %v639_v56 = vmax.f32 %v633_v53, 0.0  ;;  %v636_v57 = vadd.f32 %v2087_v51, %v635_v55  ;;  %v2355_v58 = vpop.f32.mrb[11].mxu0  ;;  %v2552_v51 = vld [vmem:[%s3290_s5 + $0x230] ss:$8 sps:$4 sm:$0xff]   ;;  %v2555_v53 = vld [vmem:[%s3290_s5 + $0x240] ss:$8 sps:$4 sm:$0xff]  }
 0x547   :  { %v2558_v55 = vld [vmem:[%s3290_s5 + $0x250] ss:$8 sps:$4 sm:$0xff]   ;;  %v2566_v58 = vld [vmem:[%s3290_s5 + $0x274] ss:$8 sps:$4 sm:$0xff]  }
 0x548   :  { %v640_v59 = vmax.f32 %v636_v57, 0.0  ;;  %v641_v60 = vadd.f32 %v639_v56, %v444_v24  ;;  %v2122_v24 = vld [vmem:[%s3293_s6 + $0x2] ss:$0 sm:$0xff]  ;;  %v2563_v56 = vld [vmem:[%s3290_s5 + $0x264] ss:$8 sps:$4 sm:$0xff]  }
 0x549   :  { %v2561_v57 = vld [vmem:[%s3290_s5 + $0x260] ss:$8 sps:$4 sm:$0xff]  }
 0x54a   :  { %v642_v61 = vadd.f32 %v640_v59, %v445_v26  ;;  %v2564_v59 = vld [vmem:[%s3290_s5 + $0x270] ss:$8 sps:$4 sm:$0xff]  }
 0x54c   :  { %v643_v62 = vpack.c.bf16 %v642_v61, %v641_v60 }
 0x54e   :  { %774 = vmatmul.mubr.bf16.vlgmr.msra.gmra.mrb[12].mxu0 %v643_v62 }
 0x54f   :  { %2364 = vmatprep.mubr.msk.bf16.mxu0 %vm2658_vm0, %v2657_v18 }
 0x621   :  { %v775_v63 = vpop.f32.mrb[12].mxu0 }
 0x622   :  { %v777_v0 = vpop.f32.mrb[13].mxu0 }
 0x623   :  { %v785_v2 = vadd.f32 %v777_v0, %v588_v30  ;;  %v779_v3 = vpop.f32.mrb[14].mxu0 }
 0x624   :  { %v784_v5 = vpack.c.bf16 %v779_v3, %v775_v63  ;;  %v781_v6 = vpop.f32.mrb[15].mxu0 }
 0x625   :  { %v786_v7 = vadd.f32 %v781_v6, %v589_v35 }
 0x626   :  { %2357 = vmatpush3.bf16.msra.mxu1 %v784_v5 }
 0x627   :  { %938 = vmatprep.subr.bf16.mxu1 %v2521_v4 }
 0x629   :  { %2359 = vmatmul.mubr.msk.bf16.vlgmr.msra.gmra.mrb[12].mxu1 %vm204_vm1, %v2773_v25 }
 0x62a   :  { %939 = vmatpush1.bf16.msra.mxu1 %v2519_v8  ;;  %970 = vmatprep.mubr.bf16.mxu1 %v2656_v1 }
 0x62b   :  { %940 = vmatprep.subr.bf16.mxu1 %v2524_v9 }
 0x62e   :  { %941 = vmatpush1.bf16.msra.mxu1 %v2522_v10 }
 0x62f   :  { %942 = vmatprep.subr.bf16.mxu1 %v2527_v11 }
 0x632   :  { %943 = vmatpush1.bf16.msra.mxu1 %v2525_v12 }
 0x633   :  { %944 = vmatprep.subr.bf16.mxu1 %v2530_v13  ;;  %v2569_v13 = vld [vmem:[%s3290_s5 + $0x284] ss:$8 sps:$4 sm:$0xff]  }
 0x636   :  { %945 = vmatpush1.bf16.msra.mxu1 %v2528_v14 }
 0x637   :  { %946 = vmatprep.subr.bf16.mxu1 %v2533_v15 }
 0x63a   :  { %947 = vmatpush1.bf16.msra.mxu1 %v2531_v16 }
 0x63b   :  { %948 = vmatprep.subr.bf16.mxu1 %v2536_v17  ;;  %v2567_v17 = vld [vmem:[%s3290_s5 + $0x280] ss:$8 sps:$4 sm:$0xff]  }
 0x63e   :  { %949 = vmatpush1.bf16.msra.mxu1 %v2534_v19  ;;  %v2572_v19 = vld [vmem:[%s3290_s5 + $0x294] ss:$8 sps:$4 sm:$0xff]  }
 0x63f   :  { %950 = vmatprep.subr.bf16.mxu1 %v2539_v20  ;;  %v2570_v20 = vld [vmem:[%s3290_s5 + $0x290] ss:$8 sps:$4 sm:$0xff]  }
 0x642   :  { %951 = vmatpush1.bf16.msra.mxu1 %v2537_v21  ;;  %v2575_v21 = vld [vmem:[%s3290_s5 + $0x2a4] ss:$8 sps:$4 sm:$0xff]  }
 0x643   :  { %952 = vmatprep.subr.bf16.mxu1 %v2542_v22  ;;  %v2573_v22 = vld [vmem:[%s3290_s5 + $0x2a0] ss:$8 sps:$4 sm:$0xff]  }
 0x646   :  { %953 = vmatpush1.bf16.msra.mxu1 %v2540_v23  ;;  %v2578_v23 = vld [vmem:[%s3290_s5 + $0x2b4] ss:$8 sps:$4 sm:$0xff]  }
 0x647   :  { %2368 = vmatprep.subr.bf16.mxu1 %v2657_v18 }
 0x6fc   :  { %v829_v26 = vpop.f32.mrb[12].mxu1 }
 0x6fd   :  { %v830_v27 = vadd.f32 %v2122_v24, %v829_v26  ;;  %v2360_v28 = vpop.f32.mrb[13].mxu1  ;;  %v2581_v26 = vld [vmem:[%s3290_s5 + $0x2c4] ss:$8 sps:$4 sm:$0xff]  }
 0x6fe   :  { %v832_v29 = vpop.f32.mrb[14].mxu1  ;;  %v2584_v28 = vld [vmem:[%s3290_s5 + $0x2d4] ss:$8 sps:$4 sm:$0xff]  }
 0x6ff   :  { %v836_v30 = vmax.f32 %v830_v27, 0.0  ;;  %v833_v31 = vadd.f32 %v2122_v24, %v832_v29  ;;  %v2361_v32 = vpop.f32.mrb[15].mxu1  ;;  %v2576_v24 = vld [vmem:[%s3290_s5 + $0x2b0] ss:$8 sps:$4 sm:$0xff]   ;;  %v2579_v27 = vld [vmem:[%s3290_s5 + $0x2c0] ss:$8 sps:$4 sm:$0xff]  }
 0x700   :  { %v2582_v29 = vld [vmem:[%s3290_s5 + $0x2d0] ss:$8 sps:$4 sm:$0xff]   ;;  %v2590_v32 = vld [vmem:[%s3290_s5 + $0x2f4] ss:$8 sps:$4 sm:$0xff]  }
 0x701   :  { %v837_v33 = vmax.f32 %v833_v31, 0.0  ;;  %v838_v34 = vadd.f32 %v836_v30, %v641_v60  ;;  %v2157_v60 = vld [vmem:[%s3293_s6 + $0x3] ss:$0 sm:$0xff]  ;;  %v2587_v30 = vld [vmem:[%s3290_s5 + $0x2e4] ss:$8 sps:$4 sm:$0xff]  }
 0x702   :  { %v2585_v31 = vld [vmem:[%s3290_s5 + $0x2e0] ss:$8 sps:$4 sm:$0xff]  }
 0x703   :  { %v839_v35 = vadd.f32 %v837_v33, %v642_v61  ;;  %v2588_v33 = vld [vmem:[%s3290_s5 + $0x2f0] ss:$8 sps:$4 sm:$0xff]  }
 0x705   :  { %v840_v36 = vpack.c.bf16 %v839_v35, %v838_v34 }
 0x707   :  { %971 = vmatmul.mubr.bf16.vlgmr.msra.gmra.mrb[16].mxu1 %v840_v36 }
 0x708   :  { %2370 = vmatprep.mubr.msk.bf16.mxu1 %vm2658_vm0, %v2657_v18 }
 0x7da   :  { %v972_v37 = vpop.f32.mrb[16].mxu1 }
 0x7db   :  { %v974_v38 = vpop.f32.mrb[17].mxu1 }
 0x7dc   :  { %v982_v39 = vadd.f32 %v974_v38, %v785_v2  ;;  %v976_v40 = vpop.f32.mrb[18].mxu1 }
 0x7dd   :  { %v981_v42 = vpack.c.bf16 %v976_v40, %v972_v37  ;;  %v978_v43 = vpop.f32.mrb[19].mxu1 }
 0x7de   :  { %v983_v44 = vadd.f32 %v978_v43, %v786_v7 }
 0x7df   :  { %2363 = vmatpush3.bf16.msra.mxu0 %v981_v42 }
 0x7e0   :  { %1135 = vmatprep.subr.bf16.mxu0 %v2545_v41 }
 0x7e2   :  { %2365 = vmatmul.mubr.msk.bf16.vlgmr.msra.gmra.mrb[16].mxu0 %vm204_vm1, %v2773_v25 }
 0x7e3   :  { %1136 = vmatpush1.bf16.msra.mxu0 %v2543_v45  ;;  %1167 = vmatprep.mubr.bf16.mxu0 %v2656_v1 }
 0x7e4   :  { %1137 = vmatprep.subr.bf16.mxu0 %v2548_v46 }
 0x7e7   :  { %1138 = vmatpush1.bf16.msra.mxu0 %v2546_v47 }
 0x7e8   :  { %1139 = vmatprep.subr.bf16.mxu0 %v2551_v48 }
 0x7eb   :  { %1140 = vmatpush1.bf16.msra.mxu0 %v2549_v49 }
 0x7ec   :  { %1141 = vmatprep.subr.bf16.mxu0 %v2554_v50  ;;  %v2593_v50 = vld [vmem:[%s3290_s5 + $0x304] ss:$8 sps:$4 sm:$0xff]  }
 0x7ef   :  { %1142 = vmatpush1.bf16.msra.mxu0 %v2552_v51 }
 0x7f0   :  { %1143 = vmatprep.subr.bf16.mxu0 %v2557_v52 }
 0x7f3   :  { %1144 = vmatpush1.bf16.msra.mxu0 %v2555_v53 }
 0x7f4   :  { %1145 = vmatprep.subr.bf16.mxu0 %v2560_v54  ;;  %v2591_v54 = vld [vmem:[%s3290_s5 + $0x300] ss:$8 sps:$4 sm:$0xff]  }
 0x7f7   :  { %1146 = vmatpush1.bf16.msra.mxu0 %v2558_v55  ;;  %v2596_v55 = vld [vmem:[%s3290_s5 + $0x314] ss:$8 sps:$4 sm:$0xff]  }
 0x7f8   :  { %1147 = vmatprep.subr.bf16.mxu0 %v2563_v56  ;;  %v2594_v56 = vld [vmem:[%s3290_s5 + $0x310] ss:$8 sps:$4 sm:$0xff]  }
 0x7fb   :  { %1148 = vmatpush1.bf16.msra.mxu0 %v2561_v57  ;;  %v2599_v57 = vld [vmem:[%s3290_s5 + $0x324] ss:$8 sps:$4 sm:$0xff]  }
 0x7fc   :  { %1149 = vmatprep.subr.bf16.mxu0 %v2566_v58  ;;  %v2597_v58 = vld [vmem:[%s3290_s5 + $0x320] ss:$8 sps:$4 sm:$0xff]  }
 0x7ff   :  { %1150 = vmatpush1.bf16.msra.mxu0 %v2564_v59  ;;  %v2602_v59 = vld [vmem:[%s3290_s5 + $0x334] ss:$8 sps:$4 sm:$0xff]  }
 0x800   :  { %2374 = vmatprep.subr.bf16.mxu0 %v2657_v18 }
 0x8b5   :  { %v1026_v61 = vpop.f32.mrb[16].mxu0 }
 0x8b6   :  { %v1027_v62 = vadd.f32 %v2157_v60, %v1026_v61  ;;  %v2366_v63 = vpop.f32.mrb[17].mxu0  ;;  %v2605_v61 = vld [vmem:[%s3290_s5 + $0x344] ss:$8 sps:$4 sm:$0xff]  }
 0x8b7   :  { %v1029_v0 = vpop.f32.mrb[18].mxu0  ;;  %v2608_v63 = vld [vmem:[%s3290_s5 + $0x354] ss:$8 sps:$4 sm:$0xff]  }
 0x8b8   :  { %v1033_v2 = vmax.f32 %v1027_v62, 0.0  ;;  %v1030_v3 = vadd.f32 %v2157_v60, %v1029_v0  ;;  %v2367_v4 = vpop.f32.mrb[19].mxu0  ;;  %v2600_v60 = vld [vmem:[%s3290_s5 + $0x330] ss:$8 sps:$4 sm:$0xff]   ;;  %v2603_v62 = vld [vmem:[%s3290_s5 + $0x340] ss:$8 sps:$4 sm:$0xff]  }
 0x8b9   :  { %v2606_v0 = vld [vmem:[%s3290_s5 + $0x350] ss:$8 sps:$4 sm:$0xff]   ;;  %v2614_v4 = vld [vmem:[%s3290_s5 + $0x374] ss:$8 sps:$4 sm:$0xff]  }
 0x8ba   :  { %v1034_v5 = vmax.f32 %v1030_v3, 0.0  ;;  %v1035_v6 = vadd.f32 %v1033_v2, %v838_v34  ;;  %v2192_v34 = vld [vmem:[%s3293_s6 + $0x4] ss:$0 sm:$0xff]  ;;  %v2609_v3 = vld [vmem:[%s3290_s5 + $0x360] ss:$8 sps:$4 sm:$0xff]  }
 0x8bb   :  { %v2611_v2 = vld [vmem:[%s3290_s5 + $0x364] ss:$8 sps:$4 sm:$0xff]  }
 0x8bc   :  { %v1036_v7 = vadd.f32 %v1034_v5, %v839_v35  ;;  %v2612_v5 = vld [vmem:[%s3290_s5 + $0x370] ss:$8 sps:$4 sm:$0xff]  }
 0x8be   :  { %v1037_v8 = vpack.c.bf16 %v1036_v7, %v1035_v6 }
 0x8c0   :  { %1168 = vmatmul.mubr.bf16.vlgmr.msra.gmra.mrb[20].mxu0 %v1037_v8 }
 0x8c1   :  { %2376 = vmatprep.mubr.msk.bf16.mxu0 %vm2658_vm0, %v2657_v18 }
 0x993   :  { %v1169_v9 = vpop.f32.mrb[20].mxu0 }
 0x994   :  { %v1171_v10 = vpop.f32.mrb[21].mxu0 }
 0x995   :  { %v1179_v11 = vadd.f32 %v1171_v10, %v982_v39  ;;  %v1173_v12 = vpop.f32.mrb[22].mxu0 }
 0x996   :  { %v1178_v14 = vpack.c.bf16 %v1173_v12, %v1169_v9  ;;  %v1175_v15 = vpop.f32.mrb[23].mxu0 }
 0x997   :  { %v1180_v16 = vadd.f32 %v1175_v15, %v983_v44 }
 0x998   :  { %2369 = vmatpush3.bf16.msra.mxu1 %v1178_v14 }
 0x999   :  { %1332 = vmatprep.subr.bf16.mxu1 %v2569_v13 }
 0x99b   :  { %2371 = vmatmul.mubr.msk.bf16.vlgmr.msra.gmra.mrb[20].mxu1 %vm204_vm1, %v2773_v25 }
 0x99c   :  { %1333 = vmatpush1.bf16.msra.mxu1 %v2567_v17  ;;  %1364 = vmatprep.mubr.bf16.mxu1 %v2656_v1 }
 0x99d   :  { %1334 = vmatprep.subr.bf16.mxu1 %v2572_v19 }
 0x9a0   :  { %1335 = vmatpush1.bf16.msra.mxu1 %v2570_v20 }
 0x9a1   :  { %1336 = vmatprep.subr.bf16.mxu1 %v2575_v21 }
 0x9a4   :  { %1337 = vmatpush1.bf16.msra.mxu1 %v2573_v22 }
 0x9a5   :  { %1338 = vmatprep.subr.bf16.mxu1 %v2578_v23  ;;  %v2617_v23 = vld [vmem:[%s3290_s5 + $0x384] ss:$8 sps:$4 sm:$0xff]  }
 0x9a8   :  { %1339 = vmatpush1.bf16.msra.mxu1 %v2576_v24 }
 0x9a9   :  { %1340 = vmatprep.subr.bf16.mxu1 %v2581_v26 }
 0x9ac   :  { %1341 = vmatpush1.bf16.msra.mxu1 %v2579_v27 }
 0x9ad   :  { %1342 = vmatprep.subr.bf16.mxu1 %v2584_v28  ;;  %v2615_v28 = vld [vmem:[%s3290_s5 + $0x380] ss:$8 sps:$4 sm:$0xff]  }
 0x9b0   :  { %1343 = vmatpush1.bf16.msra.mxu1 %v2582_v29  ;;  %v2620_v29 = vld [vmem:[%s3290_s5 + $0x394] ss:$8 sps:$4 sm:$0xff]  }
 0x9b1   :  { %1344 = vmatprep.subr.bf16.mxu1 %v2587_v30  ;;  %v2618_v30 = vld [vmem:[%s3290_s5 + $0x390] ss:$8 sps:$4 sm:$0xff]  }
 0x9b4   :  { %1345 = vmatpush1.bf16.msra.mxu1 %v2585_v31  ;;  %v2623_v31 = vld [vmem:[%s3290_s5 + $0x3a4] ss:$8 sps:$4 sm:$0xff]  }
 0x9b5   :  { %1346 = vmatprep.subr.bf16.mxu1 %v2590_v32  ;;  %v2621_v32 = vld [vmem:[%s3290_s5 + $0x3a0] ss:$8 sps:$4 sm:$0xff]  }
 0x9b8   :  { %1347 = vmatpush1.bf16.msra.mxu1 %v2588_v33  ;;  %v2626_v33 = vld [vmem:[%s3290_s5 + $0x3b4] ss:$8 sps:$4 sm:$0xff]  }
 0x9b9   :  { %2380 = vmatprep.subr.bf16.mxu1 %v2657_v18 }
 0xa6e   :  { %v1223_v35 = vpop.f32.mrb[20].mxu1 }
 0xa6f   :  { %v1224_v36 = vadd.f32 %v2192_v34, %v1223_v35  ;;  %v2372_v37 = vpop.f32.mrb[21].mxu1  ;;  %v2627_v35 = vld [vmem:[%s3290_s5 + $0x3c0] ss:$8 sps:$4 sm:$0xff]  }
 0xa70   :  { %v1226_v38 = vpop.f32.mrb[22].mxu1  ;;  %v2630_v37 = vld [vmem:[%s3290_s5 + $0x3d0] ss:$8 sps:$4 sm:$0xff]  }
 0xa71   :  { %v1230_v39 = vmax.f32 %v1224_v36, 0.0  ;;  %v1227_v40 = vadd.f32 %v2192_v34, %v1226_v38  ;;  %v2373_v41 = vpop.f32.mrb[23].mxu1  ;;  %v2629_v34 = vld [vmem:[%s3290_s5 + $0x3c4] ss:$8 sps:$4 sm:$0xff]   ;;  %v2632_v36 = vld [vmem:[%s3290_s5 + $0x3d4] ss:$8 sps:$4 sm:$0xff]  }
 0xa72   :  { %v2635_v38 = vld [vmem:[%s3290_s5 + $0x3e4] ss:$8 sps:$4 sm:$0xff]   ;;  %v2636_v41 = vld [vmem:[%s3290_s5 + $0x3f0] ss:$8 sps:$4 sm:$0xff]  }
 0xa73   :  { %v1231_v42 = vmax.f32 %v1227_v40, 0.0  ;;  %v1232_v43 = vadd.f32 %v1230_v39, %v1035_v6  ;;  %v2227_v6 = vld [vmem:[%s3293_s6 + $0x5] ss:$0 sm:$0xff]  ;;  %v2633_v39 = vld [vmem:[%s3290_s5 + $0x3e0] ss:$8 sps:$4 sm:$0xff]  }
 0xa74   :  { %v2638_v40 = vld [vmem:[%s3290_s5 + $0x3f4] ss:$8 sps:$4 sm:$0xff]  }
 0xa75   :  { %v1233_v44 = vadd.f32 %v1231_v42, %v1036_v7  ;;  %v2262_v42 = vld [vmem:[%s3293_s6 + $0x6] ss:$0 sm:$0xff] }
 0xa77   :  { %v1234_v45 = vpack.c.bf16 %v1233_v44, %v1232_v43 }
 0xa79   :  { %1365 = vmatmul.mubr.bf16.vlgmr.msra.gmra.mrb[24].mxu1 %v1234_v45 }
 0xa7a   :  { %2382 = vmatprep.mubr.msk.bf16.mxu1 %vm2658_vm0, %v2657_v18 }
 0xb4c   :  { %v1366_v46 = vpop.f32.mrb[24].mxu1 }
 0xb4d   :  { %v1368_v47 = vpop.f32.mrb[25].mxu1 }
 0xb4e   :  { %v1376_v48 = vadd.f32 %v1368_v47, %v1179_v11  ;;  %v1370_v49 = vpop.f32.mrb[26].mxu1 }
 0xb4f   :  { %v1375_v51 = vpack.c.bf16 %v1370_v49, %v1366_v46  ;;  %v1372_v52 = vpop.f32.mrb[27].mxu1 }
 0xb50   :  { %v1377_v53 = vadd.f32 %v1372_v52, %v1180_v16 }
 0xb51   :  { %2375 = vmatpush3.bf16.msra.mxu0 %v1375_v51 }
 0xb52   :  { %1529 = vmatprep.subr.bf16.mxu0 %v2593_v50 }
 0xb54   :  { %2377 = vmatmul.mubr.msk.bf16.vlgmr.msra.gmra.mrb[24].mxu0 %vm204_vm1, %v2773_v25 }
 0xb55   :  { %1530 = vmatpush1.bf16.msra.mxu0 %v2591_v54  ;;  %1561 = vmatprep.mubr.bf16.mxu0 %v2656_v1 }
 0xb56   :  { %1531 = vmatprep.subr.bf16.mxu0 %v2596_v55 }
 0xb59   :  { %1532 = vmatpush1.bf16.msra.mxu0 %v2594_v56 }
 0xb5a   :  { %1533 = vmatprep.subr.bf16.mxu0 %v2599_v57 }
 0xb5d   :  { %1534 = vmatpush1.bf16.msra.mxu0 %v2597_v58 }
 0xb5e   :  { %1535 = vmatprep.subr.bf16.mxu0 %v2602_v59 }
 0xb61   :  { %1536 = vmatpush1.bf16.msra.mxu0 %v2600_v60 }
 0xb62   :  { %1537 = vmatprep.subr.bf16.mxu0 %v2605_v61  ;;  %v2639_v61 = vld [vmem:[%s3294_s7] sm:$0xff]  }
 0xb65   :  { %1538 = vmatpush1.bf16.msra.mxu0 %v2603_v62  ;;  %v2640_v62 = vld [vmem:[%s3294_s7 + $0x8] sm:$0xff]  }
 0xb66   :  { %1539 = vmatprep.subr.bf16.mxu0 %v2608_v63  ;;  %v2641_v63 = vld [vmem:[%s3294_s7 + $0x10] sm:$0xff]  }
 0xb69   :  { %1540 = vmatpush1.bf16.msra.mxu0 %v2606_v0  ;;  %v2643_v0 = vld [vmem:[%s3294_s7 + $0x20] sm:$0xff]  }
 0xb6a   :  { %1541 = vmatprep.subr.bf16.mxu0 %v2611_v2  ;;  %v2644_v2 = vld [vmem:[%s3294_s7 + $0x28] sm:$0xff]  }
 0xb6d   :  { %1542 = vmatpush1.bf16.msra.mxu0 %v2609_v3  ;;  %v2645_v3 = vld [vmem:[%s3294_s7 + $0x30] sm:$0xff]  }
 0xb6e   :  { %1543 = vmatprep.subr.bf16.mxu0 %v2614_v4  ;;  %v2646_v4 = vld [vmem:[%s3294_s7 + $0x38] sm:$0xff]  }
 0xb71   :  { %1544 = vmatpush1.bf16.msra.mxu0 %v2612_v5  ;;  %v2297_v5 = vld [vmem:[%s3293_s6 + $0x7] ss:$0 sm:$0xff] }
 0xb72   :  { %2386 = vmatprep.subr.bf16.mxu0 %v2657_v18 }
 0xc27   :  { %v1420_v7 = vpop.f32.mrb[24].mxu0 }
 0xc28   :  { %v1421_v8 = vadd.f32 %v2227_v6, %v1420_v7  ;;  %v2378_v9 = vpop.f32.mrb[25].mxu0 }
 0xc29   :  { %v1423_v10 = vpop.f32.mrb[26].mxu0 }
 0xc2a   :  { %v1427_v11 = vmax.f32 %v1421_v8, 0.0  ;;  %v1424_v12 = vadd.f32 %v2227_v6, %v1423_v10  ;;  %v2379_v13 = vpop.f32.mrb[27].mxu0 }
 0xc2c   :  { %v1428_v14 = vmax.f32 %v1424_v12, 0.0  ;;  %v1429_v15 = vadd.f32 %v1427_v11, %v1232_v43 }
 0xc2e   :  { %v1430_v16 = vadd.f32 %v1428_v14, %v1233_v44 }
 0xc30   :  { %v1431_v17 = vpack.c.bf16 %v1430_v16, %v1429_v15 }
 0xc32   :  { %1562 = vmatmul.mubr.bf16.vlgmr.msra.gmra.mrb[28].mxu0 %v1431_v17 }
 0xc33   :  { %2388 = vmatprep.mubr.msk.bf16.mxu0 %vm2658_vm0, %v2657_v18 }
 0xd05   :  { %v1563_v19 = vpop.f32.mrb[28].mxu0 }
 0xd06   :  { %v1565_v20 = vpop.f32.mrb[29].mxu0 }
 0xd07   :  { %v1573_v21 = vadd.f32 %v1565_v20, %v1376_v48  ;;  %v1567_v22 = vpop.f32.mrb[30].mxu0 }
 0xd08   :  { %v1572_v24 = vpack.c.bf16 %v1567_v22, %v1563_v19  ;;  %v1569_v26 = vpop.f32.mrb[31].mxu0 }
 0xd09   :  { %v1574_v27 = vadd.f32 %v1569_v26, %v1377_v53  ;;  %v1982_v26 = vlaneseq }
 0xd0a   :  { %2381 = vmatpush3.bf16.msra.mxu1 %v1572_v24  ;;  %v2655_v24 = vld [vmem:[%s3289_s1] sm:$0xff]  }
 0xd0b   :  { %1726 = vmatprep.subr.bf16.mxu1 %v2617_v23 }
 0xd0d   :  { %2383 = vmatmul.mubr.msk.bf16.vlgmr.msra.gmra.mrb[28].mxu1 %vm204_vm1, %v2773_v25 }
 0xd0e   :  { %1727 = vmatpush1.bf16.msra.mxu1 %v2615_v28  ;;  %1758 = vmatprep.mubr.bf16.mxu1 %v2656_v1  ;;  %v2624_v1 = vld [vmem:[%s3290_s5 + $0x3b0] ss:$8 sps:$4 sm:$0xff]   ;;  %v2307_v28 = vld [vmem:[%s3295_s8] ss:$0 sm:$0xff] }
 0xd0f   :  { %1728 = vmatprep.subr.bf16.mxu1 %v2620_v29 }
 0xd12   :  { %1729 = vmatpush1.bf16.msra.mxu1 %v2618_v30 }
 0xd13   :  { %1730 = vmatprep.subr.bf16.mxu1 %v2623_v31 }
 0xd16   :  { %1731 = vmatpush1.bf16.msra.mxu1 %v2621_v32 }
 0xd17   :  { %1732 = vmatprep.subr.bf16.mxu1 %v2626_v33 }
 0xd1a   :  { %1733 = vmatpush1.bf16.msra.mxu1 %v2624_v1 }
 0xd1b   :  { %1734 = vmatprep.subr.bf16.mxu1 %v2629_v34 }
 0xd1e   :  { %1735 = vmatpush1.bf16.msra.mxu1 %v2627_v35 }
 0xd1f   :  { %1736 = vmatprep.subr.bf16.mxu1 %v2632_v36 }
 0xd22   :  { %1737 = vmatpush1.bf16.msra.mxu1 %v2630_v37 }
 0xd23   :  { %1738 = vmatprep.subr.bf16.mxu1 %v2635_v38 }
 0xd26   :  { %1739 = vmatpush1.bf16.msra.mxu1 %v2633_v39 }
 0xd27   :  { %1740 = vmatprep.subr.bf16.mxu1 %v2638_v40 }
 0xd2a   :  { %1741 = vmatpush1.bf16.msra.mxu1 %v2636_v41 }
 0xd2b   :  { %2412 = vmatprep.subr.bf16.mxu1 %v2657_v18 }
 0xde0   :  { %v1617_v43 = vpop.f32.mrb[28].mxu1 }
 0xde1   :  { %v1618_v44 = vadd.f32 %v2262_v42, %v1617_v43  ;;  %v2384_v45 = vpop.f32.mrb[29].mxu1 }
 0xde2   :  { %v1620_v46 = vpop.f32.mrb[30].mxu1 }
 0xde3   :  { %v1624_v47 = vmax.f32 %v1618_v44, 0.0  ;;  %v1621_v48 = vadd.f32 %v2262_v42, %v1620_v46  ;;  %v2385_v49 = vpop.f32.mrb[31].mxu1 }
 0xde5   :  { %v1625_v50 = vmax.f32 %v1621_v48, 0.0  ;;  %v1626_v51 = vadd.f32 %v1624_v47, %v1429_v15 }
 0xde7   :  { %v1627_v52 = vadd.f32 %v1625_v50, %v1430_v16 }
 0xde9   :  { %v1628_v53 = vpack.c.bf16 %v1627_v52, %v1626_v51 }
 0xdeb   :  { %1759 = vmatmul.mubr.bf16.vlgmr.msra.gmra.mrb[32].mxu1 %v1628_v53 }
 0xdec   :  { %2414 = vmatprep.mubr.msk.bf16.mxu1 %vm2658_vm0, %v2657_v18 }
 0xebe   :  { %v1760_v54 = vpop.f32.mrb[32].mxu1 }
 0xebf   :  { %v1762_v55 = vpop.f32.mrb[33].mxu1 }
 0xec0   :  { %v1770_v56 = vadd.f32 %v1762_v55, %v1573_v21  ;;  %v1764_v57 = vpop.f32.mrb[34].mxu1 }
 0xec1   :  { %v1769_v58 = vpack.c.bf16 %v1764_v57, %v1760_v54  ;;  %v1766_v59 = vpop.f32.mrb[35].mxu1 }
 0xec2   :  { %v1771_v60 = vadd.f32 %v1766_v59, %v1574_v27  ;;  %v1983_v27 = vand.u32 127, %v1982_v26 }
 0xec3   :  { %2387 = vmatpush3.bf16.msra.mxu0 %v1769_v58 }
 0xec4   :  { %2392 = vmatprep.subr.bf16.mxu0 %v2657_v18  ;;  %vm1984_vm2 = vcmp.lt.s32.totalorder %v1983_v27, 4 }
 0xec6   :  { %2389 = vmatmul.mubr.msk.bf16.vlgmr.msra.gmra.mrb[32].mxu0 %vm204_vm1, %v2773_v25  ;;  %v2642_v25 = vld [vmem:[%s3294_s7 + $0x18] sm:$0xff]  }
 0xec7   :  { %2393 = vmatpush3.bf16.msra.mxu0 %v2639_v61  ;;  %2408 = vmatprep.mubr.msk.bf16.mxu0 %vm2658_vm0, %v2657_v18 }
 0xec8   :  { %2394 = vmatprep.subr.bf16.mxu0 %v2657_v18 }
 0xecb   :  { %2395 = vmatpush3.bf16.msra.mxu0 %v2640_v62 }
 0xecc   :  { %2396 = vmatprep.subr.bf16.mxu0 %v2657_v18 }
 0xecf   :  { %2397 = vmatpush3.bf16.msra.mxu0 %v2641_v63 }
 0xed0   :  { %2398 = vmatprep.subr.bf16.mxu0 %v2657_v18 }
 0xed3   :  { %2399 = vmatpush3.bf16.msra.mxu0 %v2642_v25 }
 0xed4   :  { %2400 = vmatprep.subr.bf16.mxu0 %v2657_v18 }
 0xed7   :  { %2401 = vmatpush3.bf16.msra.mxu0 %v2643_v0 }
 0xed8   :  { %2402 = vmatprep.subr.bf16.mxu0 %v2657_v18 }
 0xedb   :  { %2403 = vmatpush3.bf16.msra.mxu0 %v2644_v2 }
 0xedc   :  { %2404 = vmatprep.subr.bf16.mxu0 %v2657_v18 }
 0xedf   :  { %2405 = vmatpush3.bf16.msra.mxu0 %v2645_v3 }
 0xee0   :  { %2406 = vmatprep.subr.bf16.mxu0 %v2657_v18 }
 0xee3   :  { %2407 = vmatpush3.bf16.msra.mxu0 %v2646_v4 }
 0xf99   :  { %v1814_v6 = vpop.f32.mrb[32].mxu0 }
 0xf9a   :  { %v1815_v7 = vadd.f32 %v2297_v5, %v1814_v6  ;;  %v2390_v8 = vpop.f32.mrb[33].mxu0 }
 0xf9b   :  { %v1817_v9 = vpop.f32.mrb[34].mxu0 }
 0xf9c   :  { %v1821_v10 = vmax.f32 %v1815_v7, 0.0  ;;  %v1818_v11 = vadd.f32 %v2297_v5, %v1817_v9  ;;  %v2391_v12 = vpop.f32.mrb[35].mxu0 }
 0xf9e   :  { %v1822_v13 = vmax.f32 %v1818_v11, 0.0  ;;  %v1823_v14 = vadd.f32 %v1821_v10, %v1626_v51 }
 0xfa0   :  { %v1824_v15 = vadd.f32 %v1822_v13, %v1627_v52 }
 0xfa2   :  { %v1825_v18 = vpack.c.bf16 %v1824_v15, %v1823_v14 }
 0xfa4   :  { %2409 = vmatmul.mubr.bf16.vlgmr.msra.gmra.mrb[36].mxu0 %v1825_v18 }
0x1077   :  { %v1924_v16 = vpop.f32.mrb[36].mxu0 }
0x1078   :  { %v1931_v17 = vadd.f32 %v1924_v16, %v1770_v56  ;;  %v2410_v19 = vpop.f32.mrb[37].mxu0 }
0x1079   :  { %v1927_v20 = vpop.f32.mrb[38].mxu0 }
0x107a   :  { %v1932_v21 = vadd.f32 %v1927_v20, %v1771_v60  ;;  %v2411_v22 = vpop.f32.mrb[39].mxu0 }
0x107c   :  { %v1933_v23 = vpack.c.bf16 %v1932_v21, %v1931_v17 }
0x107e   :  { %2413 = vmatpush3.bf16.msra.mxu1 %v1933_v23 }
0x1081   :  { %2415 = vmatmul.mubr.msk.bf16.vlgmr.msra.gmra.mrb[36].mxu1 %vm204_vm1, %v2655_v24 }
0x1154   :  { %v1975_v29 = vpop.f32.mrb[36].mxu1 }
0x1155   :  { %v1976_v30 = vadd.f32 %v2307_v28, %v1975_v29  ;;  %v2416_v31 = vpop.f32.mrb[37].mxu1 }
0x1156   :  { %v1978_v32 = vpop.f32.mrb[38].mxu1 }
0x1157   :  { %v1985_v33 = vsel %vm1984_vm2, %v1976_v30, -inf  ;;  %v1979_v1 = vadd.f32 %v2307_v28, %v1978_v32  ;;  %v2417_v34 = vpop.f32.mrb[39].mxu1 }
0x1158   :  { %1987 = vmax.xlane.f32.xlu0 %v1985_v33 }
0x1159   :  { %v1986_v35 = vsel %vm1984_vm2, %v1979_v1, -inf }
0x115c   :  { %1989 = vmax.xlane.f32.xlu0 %v1986_v35 }
0x11e5   :  { %v1988_v36 = vpop.xlane.xlu0 %1987 }
0x11e6   :  { %v1991_v37 = vsub.f32 %v1976_v30, %v1988_v36 }
0x11e8   :  { %v1993_v38 = vmul.f32 1.442695, %v1991_v37 }
0x11e9   :  { %v1990_v39 = vpop.xlane.xlu0 %1989 }
0x11ea   :  { %2647 = vpow2.f32 %v1993_v38  ;;  %v1992_v40 = vsub.f32 %v1979_v1, %v1990_v39 }
0x11ec   :  { %v1995_v41 = vmul.f32 1.442695, %v1992_v40 }
0x11ee   :  { %2649 = vpow2.f32 %v1995_v41 }
0x11f4   :  { %v2648_v42 = vpop.eup %2647 }
0x11f5   :  { %v1997_v43 = vsel %vm1984_vm2, %v2648_v42, 0.0 }
0x11f6   :  { %1999 = vadd.xlane.f32.xlu1 %v1997_v43 }
0x11f8   :  { %v2650_v44 = vpop.eup %2649 }
0x11f9   :  { %v1998_v45 = vsel %vm1984_vm2, %v2650_v44, 0.0 }
0x11fa   :  { %2001 = vadd.xlane.f32.xlu1 %v1998_v45 }
0x1283   :  { %v2000_v46 = vpop.xlane.xlu1 %1999 }
0x1284   :  { %2651 = vlog2.f32 %v2000_v46 }
0x1287   :  { %v2002_v47 = vpop.xlane.xlu1 %2001 }
0x1288   :  { %2653 = vlog2.f32 %v2002_v47 }
0x128e   :  { %v2652_v48 = vpop.eup %2651 }
0x128f   :  { %v2004_v49 = vmul.f32 0.6931472, %v2652_v48 }
0x1291   :  { %v2007_v50 = vsub.f32 %v1991_v37, %v2004_v49 }
0x1292   :  { %v2654_v51 = vpop.eup %2653 }
0x1293   :  { %2009 = vst [vmem:[%s3296_s9] sm:$0xff] %v2007_v50  ;;  %v2006_v52 = vmul.f32 0.6931472, %v2654_v51 }
0x1295   :  { %v2008_v53 = vsub.f32 %v1992_v40, %v2006_v52 }
0x1297   :  { %2010 = vst [vmem:[%s3296_s9 + $0x8] sm:$0xff] %v2008_v53 }

</bundles_post_ra>
